<compile_context>
chip_gen: v6e
topology: v6e:2x2x1
jax: 0.10.0
libtpu: 0.0.40
codegen_flags: <defaults>
</compile_context>

<pallas_src>
import jax
import jax.numpy as jnp
import numpy as np
from jax import lax
from jax.experimental import pallas as pl
from jax.experimental.pallas import tpu as pltpu


def bottleneck_kernel(x_ref, w1_ref, b1_ref, w2_ref, b2_ref, w3_ref, b3_ref,
                      o_ref):
    H, W, Cin = x_ref.shape
    P = b1_ref.shape[1]
    Cout = o_ref.shape[2]

    # ---- conv1 (1x1, BN1 scale folded into w1) + bias + ReLU ----------------
    xb = x_ref[...].reshape(H * W, Cin).astype(jnp.bfloat16)
    t1 = jnp.dot(xb, w1_ref[...], preferred_element_type=jnp.float32)
    # Cast to bf16 once: the 3x3 matmul operands are bf16 anyway, and all the
    # padded / shifted / im2col buffers below now carry half the bytes.
    t1 = jnp.maximum(t1 + b1_ref[...], 0.0).astype(jnp.bfloat16)  # (H*W, P)

    # ---- conv2 (3x3, stride=1, padding=1) as ONE im2col matmul, K = 9P ------
    # H padding via leading-dim concat (layout-aligned, cheap); the +-1 shift
    # along W is built with a zero column + aligned concat instead of
    # offset-1 sublane slices of a scratch ref.
    t1_3d = t1.reshape(H, W, P)
    zrow = jnp.zeros((1, W, P), jnp.bfloat16)
    padv = jnp.concatenate([zrow, t1_3d, zrow], axis=0)           # (H+2, W, P)
    zcol = jnp.zeros((H + 2, 1, P), jnp.bfloat16)
    sh = (jnp.concatenate([zcol, padv[:, :W - 1, :]], axis=1),    # kx=0: [w]=pad[w-1]
          padv,                                                   # kx=1: [w]=pad[w]
          jnp.concatenate([padv[:, 1:, :], zcol], axis=1))        # kx=2: [w]=pad[w+1]
    # window(ky,kx)[h,w,:] = in_pad[h+ky, w+kx, :]; stack (ky,kx) row-major
    # along channels to match w2_ref's (3,3,P,P)->(9P,P) flattening.
    win = jnp.concatenate(
        [sh[kx][ky:ky + H] for ky in range(3) for kx in range(3)], axis=-1)
    t2 = jnp.dot(win.reshape(H * W, 9 * P), w2_ref[...],
                 preferred_element_type=jnp.float32)
    t2 = jnp.maximum(t2 + b2_ref[...], 0.0)                       # (H*W, P) f32

    # ---- conv3 (1x1, BN3 scale folded into w3) + bias -----------------------
    t3 = jnp.dot(t2.astype(jnp.bfloat16), w3_ref[...],
                 preferred_element_type=jnp.float32) + b3_ref[...]

    # ---- residual add (identity, downsample=None) + ReLU --------------------
    resid = x_ref[...].reshape(H * W, Cout).astype(jnp.float32)   # fresh re-read
    out = jnp.maximum(t3 + resid, 0.0)
    o_ref[...] = out.reshape(H, W, Cout).astype(o_ref.dtype)


def bottleneck_forward(x, kp):
    N, H, W, Cin = x.shape
    P = kp["b1"].shape[1]
    Cout = kp["w3"].shape[1]

    def const_spec(arr):
        nd = arr.ndim
        return pl.BlockSpec(arr.shape, lambda i, _nd=nd: (0,) * _nd)

    # VMEM budget: double-buffered in/out blocks + weights + live intermediates
    # (bf16 im2col slab, bf16 padded/shifted copies, f32 t1/t2/t3), plus
    # headroom.  Never below the 32 MiB default, never above v7x's 64 MiB.
    est = (2 * H * W * (Cin + Cout) * 4                    # in/out blocks (x2 bufs)
           + H * W * 9 * P * 2                             # im2col slab (bf16)
           + (H + 2) * W * P * 2 * 4                       # padded + shifted (bf16)
           + H * W * (Cin + 2 * P + Cout) * 4              # f32 intermediates
           + (Cin * P + 9 * P * P + P * Cout) * 2          # weights (bf16)
           + (2 * P + Cout) * 4)                           # biases (f32)
    vmem_limit = int(min(max(2 * est + (8 << 20), 32 << 20), 64 << 20))

    return pl.pallas_call(
        bottleneck_kernel,
        out_shape=jax.ShapeDtypeStruct((N, H, W, Cout), x.dtype),
        grid_spec=pltpu.PrefetchScalarGridSpec(
            num_scalar_prefetch=0,
            grid=(N,),
            in_specs=[
                pl.BlockSpec((None, H, W, Cin), lambda i: (i, 0, 0, 0)),
                const_spec(kp["w1"]), const_spec(kp["b1"]),
                const_spec(kp["w2"]), const_spec(kp["b2"]),
                const_spec(kp["w3"]), const_spec(kp["b3"]),
            ],
            out_specs=pl.BlockSpec((None, H, W, Cout), lambda i: (i, 0, 0, 0)),
        ),
        compiler_params=pltpu.CompilerParams(
            dimension_semantics=("parallel",),
            vmem_limit_bytes=vmem_limit),
    )(x, kp["w1"], kp["b1"], kp["w2"], kp["b2"], kp["w3"], kp["b3"])


def bottleneck_ref(x, p):
    """Pure-JAX reference (NHWC, f32, BN NOT folded) = module semantics."""
    t = jnp.einsum("nhwc,cp->nhwp", x, p["w1"])
    t = jnp.maximum(t * p["s1"] + p["b1"], 0.0)
    t = lax.conv_general_dilated(
        t, p["w2"], window_strides=(1, 1), padding=((1, 1), (1, 1)),
        dimension_numbers=("NHWC", "HWIO", "NHWC"))
    t = jnp.maximum(t * p["s2"] + p["b2"], 0.0)
    t = jnp.einsum("nhwp,pq->nhwq", t, p["w3"])
    t = t * p["s3"] + p["b3"]
    return jnp.maximum(t + x, 0.0)


def make_params(key, inplanes, planes, eps=1e-5):
    ks = jax.random.split(key, 6)
    P, E = planes, planes * 4
    assert inplanes == E, "identity residual requires inplanes == planes * 4"

    def fold_bn(k, c):
        k1, k2, k3, k4 = jax.random.split(k, 4)
        gamma = 1.0 + 0.1 * jax.random.normal(k1, (c,), jnp.float32)
        beta = 0.1 * jax.random.normal(k2, (c,), jnp.float32)
        mean = 0.1 * jax.random.normal(k3, (c,), jnp.float32)
        var = 0.5 + 0.5 * jnp.abs(jax.random.normal(k4, (c,), jnp.float32))
        scale = gamma / jnp.sqrt(var + eps)
        bias = beta - mean * scale
        return scale.reshape(1, c), bias.reshape(1, c)

    # PyTorch conv weights (Cout, Cin, kh, kw).
    w1_t = 0.1 * jax.random.normal(ks[0], (P, inplanes, 1, 1), jnp.float32)
    w2_t = 0.1 * jax.random.normal(ks[1], (P, P, 3, 3), jnp.float32)
    w3_t = 0.1 * jax.random.normal(ks[2], (E, P, 1, 1), jnp.float32)

    s1, b1 = fold_bn(ks[3], P)
    s2, b2 = fold_bn(ks[4], P)
    s3, b3 = fold_bn(ks[5], E)

    w1 = jnp.transpose(w1_t[:, :, 0, 0], (1, 0))             # (Cin, P)
    w2 = jnp.transpose(w2_t, (2, 3, 1, 0))                   # (3,3,P,P) HWIO
    w3 = jnp.transpose(w3_t[:, :, 0, 0], (1, 0))             # (P, 4P)

    ref_params = {"w1": w1, "w2": w2, "w3": w3,
                  "s1": s1, "b1": b1, "s2": s2, "b2": b2, "s3": s3, "b3": b3}

    kernel_params = {
        # BN scales folded into weights; bf16 operands for the MXU.
        "w1": (w1 * s1).astype(jnp.bfloat16),                             # (Cin, P)
        "b1": b1,                                                         # (1, P) f32
        "w2": (w2 * s2.reshape(1, 1, 1, P)).reshape(9 * P, P).astype(jnp.bfloat16),
        "b2": b2,                                                         # (1, P) f32
        "w3": (w3 * s3).astype(jnp.bfloat16),                             # (P, 4P)
        "b3": b3,                                                         # (1, 4P) f32
    }
    return kernel_params, ref_params


if __name__ == "__main__":
    key = jax.random.PRNGKey(0)
    kx_, kp_ = jax.random.split(key)

    N, H, W = 2, 16, 16
    planes = 4
    inplanes = planes * 4          # 16, identity residual (downsample=None)

    # NHWC input (corresponds to PyTorch NCHW (2, 16, 16, 16) permuted).
    x = jax.random.normal(kx_, (N, H, W, inplanes), jnp.float32)
    kernel_params, ref_params = make_params(kp_, inplanes, planes)

    out = jax.block_until_ready(bottleneck_forward(x, kernel_params))
    ref = jax.block_until_ready(bottleneck_ref(x, ref_params))

    np.testing.assert_allclose(np.asarray(out), np.asarray(ref),
                               rtol=1e-2, atol=1e-2)
    print("KERNEL_OK")
</pallas_src>

<mosaic_0001>
module attributes {stable_mosaic.version = 11 : i64} {
  func.func @bottleneck_kernel(%arg0: i32, %arg1: memref<1x16x16x16xf32, #tpu.memory_space<vmem>>, %arg2: memref<16x4xbf16, #tpu.memory_space<vmem>>, %arg3: memref<1x4xf32, #tpu.memory_space<vmem>>, %arg4: memref<36x4xbf16, #tpu.memory_space<vmem>>, %arg5: memref<1x4xf32, #tpu.memory_space<vmem>>, %arg6: memref<4x16xbf16, #tpu.memory_space<vmem>>, %arg7: memref<1x16xf32, #tpu.memory_space<vmem>>, %arg8: memref<1x16x16x16xf32, #tpu.memory_space<vmem>>) attributes {dimension_semantics = [#tpu.dimension_semantics<parallel>], iteration_bounds = array<i64: 2>, scalar_prefetch = 0 : i64, scratch_operands = 0 : i64, tpu.core_type = #tpu.core_type<tc>, window_params = [{transform_indices = @transform_0, window_bounds = array<i64: 1, 16, 16, 16>}, {pipeline_mode = #tpu.pipeline_mode<synchronous>, transform_indices = @transform_1, window_bounds = array<i64: 16, 4>}, {pipeline_mode = #tpu.pipeline_mode<synchronous>, transform_indices = @transform_2, window_bounds = array<i64: 1, 4>}, {pipeline_mode = #tpu.pipeline_mode<synchronous>, transform_indices = @transform_3, window_bounds = array<i64: 36, 4>}, {pipeline_mode = #tpu.pipeline_mode<synchronous>, transform_indices = @transform_4, window_bounds = array<i64: 1, 4>}, {pipeline_mode = #tpu.pipeline_mode<synchronous>, transform_indices = @transform_5, window_bounds = array<i64: 4, 16>}, {pipeline_mode = #tpu.pipeline_mode<synchronous>, transform_indices = @transform_6, window_bounds = array<i64: 1, 16>}, {transform_indices = @transform_7, window_bounds = array<i64: 1, 16, 16, 16>}]} {
    %c0 = arith.constant 0 : index
    %c0_0 = arith.constant 0 : index
    %c0_1 = arith.constant 0 : index
    %c0_2 = arith.constant 0 : index
    %0 = vector.load %arg1[%c0, %c0_0, %c0_1, %c0_2] : memref<1x16x16x16xf32, #tpu.memory_space<vmem>>, vector<1x16x16x16xf32>
    %1 = vector.shape_cast %0 : vector<1x16x16x16xf32> to vector<16x16x16xf32>
    %2 = vector.shape_cast %1 : vector<16x16x16xf32> to vector<256x16xf32>
    %3 = arith.truncf %2 : vector<256x16xf32> to vector<256x16xbf16>
    %c0_3 = arith.constant 0 : index
    %c0_4 = arith.constant 0 : index
    %4 = vector.load %arg2[%c0_3, %c0_4] : memref<16x4xbf16, #tpu.memory_space<vmem>>, vector<16x4xbf16>
    %cst = arith.constant dense<0.000000e+00> : vector<256x4xf32>
    %5 = tpu.matmul %3, %4, %cst {dimension_numbers = #tpu.dot_dimension_numbers<[1], [0], [0], [1], [0, 0, 1, 1], [], []>} : vector<256x16xbf16>, vector<16x4xbf16>, vector<256x4xf32> -> vector<256x4xf32>
    %c0_5 = arith.constant 0 : index
    %c0_6 = arith.constant 0 : index
    %6 = vector.load %arg3[%c0_5, %c0_6] : memref<1x4xf32, #tpu.memory_space<vmem>>, vector<1x4xf32>
    %7 = vector.broadcast %6 : vector<1x4xf32> to vector<256x4xf32>
    %8 = arith.addf %5, %7 : vector<256x4xf32>
    %cst_7 = arith.constant 0.000000e+00 : f32
    %9 = vector.broadcast %cst_7 : f32 to vector<256x4xf32>
    %10 = arith.maximumf %8, %9 : vector<256x4xf32>
    %11 = arith.truncf %10 : vector<256x4xf32> to vector<256x4xbf16>
    %12 = vector.shape_cast %11 : vector<256x4xbf16> to vector<16x16x4xbf16>
    %cst_8 = arith.constant 0.000000e+00 : bf16
    %13 = vector.broadcast %cst_8 : bf16 to vector<1x16x4xbf16>
    %14 = tpu.concatenate %13, %12, %13 in 0 : vector<1x16x4xbf16>, vector<16x16x4xbf16>, vector<1x16x4xbf16> -> vector<18x16x4xbf16>
    %cst_9 = arith.constant 0.000000e+00 : bf16
    %15 = vector.broadcast %cst_9 : bf16 to vector<18x1x4xbf16>
    %16 = vector.extract_strided_slice %14 {offsets = [0, 0, 0], sizes = [18, 15, 4], strides = [1, 1, 1]} : vector<18x16x4xbf16> to vector<18x15x4xbf16>
    %17 = tpu.concatenate %15, %16 in 1 : vector<18x1x4xbf16>, vector<18x15x4xbf16> -> vector<18x16x4xbf16>
    %18 = vector.extract_strided_slice %14 {offsets = [0, 1, 0], sizes = [18, 15, 4], strides = [1, 1, 1]} : vector<18x16x4xbf16> to vector<18x15x4xbf16>
    %19 = tpu.concatenate %18, %15 in 1 : vector<18x15x4xbf16>, vector<18x1x4xbf16> -> vector<18x16x4xbf16>
    %20 = vector.extract_strided_slice %17 {offsets = [0, 0, 0], sizes = [16, 16, 4], strides = [1, 1, 1]} : vector<18x16x4xbf16> to vector<16x16x4xbf16>
    %21 = vector.extract_strided_slice %14 {offsets = [0, 0, 0], sizes = [16, 16, 4], strides = [1, 1, 1]} : vector<18x16x4xbf16> to vector<16x16x4xbf16>
    %22 = vector.extract_strided_slice %19 {offsets = [0, 0, 0], sizes = [16, 16, 4], strides = [1, 1, 1]} : vector<18x16x4xbf16> to vector<16x16x4xbf16>
    %23 = vector.extract_strided_slice %17 {offsets = [1, 0, 0], sizes = [16, 16, 4], strides = [1, 1, 1]} : vector<18x16x4xbf16> to vector<16x16x4xbf16>
    %24 = vector.extract_strided_slice %14 {offsets = [1, 0, 0], sizes = [16, 16, 4], strides = [1, 1, 1]} : vector<18x16x4xbf16> to vector<16x16x4xbf16>
    %25 = vector.extract_strided_slice %19 {offsets = [1, 0, 0], sizes = [16, 16, 4], strides = [1, 1, 1]} : vector<18x16x4xbf16> to vector<16x16x4xbf16>
    %26 = vector.extract_strided_slice %17 {offsets = [2, 0, 0], sizes = [16, 16, 4], strides = [1, 1, 1]} : vector<18x16x4xbf16> to vector<16x16x4xbf16>
    %27 = vector.extract_strided_slice %14 {offsets = [2, 0, 0], sizes = [16, 16, 4], strides = [1, 1, 1]} : vector<18x16x4xbf16> to vector<16x16x4xbf16>
    %28 = vector.extract_strided_slice %19 {offsets = [2, 0, 0], sizes = [16, 16, 4], strides = [1, 1, 1]} : vector<18x16x4xbf16> to vector<16x16x4xbf16>
    %29 = tpu.concatenate %20, %21, %22, %23, %24, %25, %26, %27, %28 in 2 : vector<16x16x4xbf16>, vector<16x16x4xbf16>, vector<16x16x4xbf16>, vector<16x16x4xbf16>, vector<16x16x4xbf16>, vector<16x16x4xbf16>, vector<16x16x4xbf16>, vector<16x16x4xbf16>, vector<16x16x4xbf16> -> vector<16x16x36xbf16>
    %30 = vector.shape_cast %29 : vector<16x16x36xbf16> to vector<256x36xbf16>
    %c0_10 = arith.constant 0 : index
    %c0_11 = arith.constant 0 : index
    %31 = vector.load %arg4[%c0_10, %c0_11] : memref<36x4xbf16, #tpu.memory_space<vmem>>, vector<36x4xbf16>
    %cst_12 = arith.constant dense<0.000000e+00> : vector<256x4xf32>
    %32 = tpu.matmul %30, %31, %cst_12 {dimension_numbers = #tpu.dot_dimension_numbers<[1], [0], [0], [1], [0, 0, 1, 1], [], []>} : vector<256x36xbf16>, vector<36x4xbf16>, vector<256x4xf32> -> vector<256x4xf32>
    %c0_13 = arith.constant 0 : index
    %c0_14 = arith.constant 0 : index
    %33 = vector.load %arg5[%c0_13, %c0_14] : memref<1x4xf32, #tpu.memory_space<vmem>>, vector<1x4xf32>
    %34 = vector.broadcast %33 : vector<1x4xf32> to vector<256x4xf32>
    %35 = arith.addf %32, %34 : vector<256x4xf32>
    %cst_15 = arith.constant 0.000000e+00 : f32
    %36 = vector.broadcast %cst_15 : f32 to vector<256x4xf32>
    %37 = arith.maximumf %35, %36 : vector<256x4xf32>
    %38 = arith.truncf %37 : vector<256x4xf32> to vector<256x4xbf16>
    %c0_16 = arith.constant 0 : index
    %c0_17 = arith.constant 0 : index
    %39 = vector.load %arg6[%c0_16, %c0_17] : memref<4x16xbf16, #tpu.memory_space<vmem>>, vector<4x16xbf16>
    %cst_18 = arith.constant dense<0.000000e+00> : vector<256x16xf32>
    %40 = tpu.matmul %38, %39, %cst_18 {dimension_numbers = #tpu.dot_dimension_numbers<[1], [0], [0], [1], [0, 0, 1, 1], [], []>} : vector<256x4xbf16>, vector<4x16xbf16>, vector<256x16xf32> -> vector<256x16xf32>
    %c0_19 = arith.constant 0 : index
    %c0_20 = arith.constant 0 : index
    %41 = vector.load %arg7[%c0_19, %c0_20] : memref<1x16xf32, #tpu.memory_space<vmem>>, vector<1x16xf32>
    %42 = vector.broadcast %41 : vector<1x16xf32> to vector<256x16xf32>
    %43 = arith.addf %40, %42 : vector<256x16xf32>
    %c0_21 = arith.constant 0 : index
    %c0_22 = arith.constant 0 : index
    %c0_23 = arith.constant 0 : index
    %c0_24 = arith.constant 0 : index
    %44 = vector.load %arg1[%c0_21, %c0_22, %c0_23, %c0_24] : memref<1x16x16x16xf32, #tpu.memory_space<vmem>>, vector<1x16x16x16xf32>
    %45 = vector.shape_cast %44 : vector<1x16x16x16xf32> to vector<16x16x16xf32>
    %46 = vector.shape_cast %45 : vector<16x16x16xf32> to vector<256x16xf32>
    %47 = arith.addf %43, %46 : vector<256x16xf32>
    %cst_25 = arith.constant 0.000000e+00 : f32
    %48 = vector.broadcast %cst_25 : f32 to vector<256x16xf32>
    %49 = arith.maximumf %47, %48 : vector<256x16xf32>
    %50 = vector.shape_cast %49 : vector<256x16xf32> to vector<16x16x16xf32>
    %c0_26 = arith.constant 0 : index
    %c0_27 = arith.constant 0 : index
    %c0_28 = arith.constant 0 : index
    %c0_29 = arith.constant 0 : index
    %51 = vector.load %arg8[%c0_26, %c0_27, %c0_28, %c0_29] : memref<1x16x16x16xf32, #tpu.memory_space<vmem>>, vector<1x16x16x16xf32>
    %52 = vector.shape_cast %51 : vector<1x16x16x16xf32> to vector<16x16x16xf32>
    %53 = vector.shape_cast %50 : vector<16x16x16xf32> to vector<1x16x16x16xf32>
    tpu.vector_store %arg8[%c0_26, %c0_27, %c0_28, %c0_29], %53 {strides = array<i32>} : memref<1x16x16x16xf32, #tpu.memory_space<vmem>>, vector<1x16x16x16xf32>,
    return
  }
  func.func @transform_0(%arg0: i32) -> (i32, i32, i32, i32) {
    %c0_i32 = arith.constant 0 : i32
    %c0_i32_0 = arith.constant 0 : i32
    %c0_i32_1 = arith.constant 0 : i32
    %c0_i32_2 = arith.constant 0 : i32
    return %arg0, %c0_i32, %c0_i32_0, %c0_i32_1 : i32, i32, i32, i32
  }
  func.func @transform_1(%arg0: i32) -> (i32, i32) {
    %c0_i32 = arith.constant 0 : i32
    %c0_i32_0 = arith.constant 0 : i32
    %c0_i32_1 = arith.constant 0 : i32
    return %c0_i32, %c0_i32_0 : i32, i32
  }
  func.func @transform_2(%arg0: i32) -> (i32, i32) {
    %c0_i32 = arith.constant 0 : i32
    %c0_i32_0 = arith.constant 0 : i32
    %c0_i32_1 = arith.constant 0 : i32
    return %c0_i32, %c0_i32_0 : i32, i32
  }
  func.func @transform_3(%arg0: i32) -> (i32, i32) {
    %c0_i32 = arith.constant 0 : i32
    %c0_i32_0 = arith.constant 0 : i32
    %c0_i32_1 = arith.constant 0 : i32
    return %c0_i32, %c0_i32_0 : i32, i32
  }
  func.func @transform_4(%arg0: i32) -> (i32, i32) {
    %c0_i32 = arith.constant 0 : i32
    %c0_i32_0 = arith.constant 0 : i32
    %c0_i32_1 = arith.constant 0 : i32
    return %c0_i32, %c0_i32_0 : i32, i32
  }
  func.func @transform_5(%arg0: i32) -> (i32, i32) {
    %c0_i32 = arith.constant 0 : i32
    %c0_i32_0 = arith.constant 0 : i32
    %c0_i32_1 = arith.constant 0 : i32
    return %c0_i32, %c0_i32_0 : i32, i32
  }
  func.func @transform_6(%arg0: i32) -> (i32, i32) {
    %c0_i32 = arith.constant 0 : i32
    %c0_i32_0 = arith.constant 0 : i32
    %c0_i32_1 = arith.constant 0 : i32
    return %c0_i32, %c0_i32_0 : i32, i32
  }
  func.func @transform_7(%arg0: i32) -> (i32, i32, i32, i32) {
    %c0_i32 = arith.constant 0 : i32
    %c0_i32_0 = arith.constant 0 : i32
    %c0_i32_1 = arith.constant 0 : i32
    %c0_i32_2 = arith.constant 0 : i32
    return %arg0, %c0_i32, %c0_i32_0, %c0_i32_1 : i32, i32, i32, i32
  }
}

</mosaic_0001>

<bundles_post_ra>
// kernel: tpu_custom_call.1
= control target key start
LH: loop header
LB: loop body
LE: loop exit
PB: predicated region body
PF: predicated region fallthrough
CT: control target
= control target key end

     0   :  { %12 = vsyncpa [#allocation3], 0  ;;  %s3775_s0 = inlined_call_operand.hbm [shape: f32[2,16,16,16], index: 0, kind: input, shape index: {}]   ;;  %s3776_s1 = inlined_call_operand.vmem [shape: bf16[16,4], index: 1, kind: input, shape index: {}]   ;;  %s3777_s2 = inlined_call_operand.vmem [shape: f32[1,4], index: 2, kind: input, shape index: {}]   ;;  %s3778_s3 = inlined_call_operand.vmem [shape: bf16[36,4], index: 3, kind: input, shape index: {}]   ;;  %s3779_s4 = inlined_call_operand.vmem [shape: f32[1,4], index: 4, kind: input, shape index: {}]   ;;  %s3780_s5 = inlined_call_operand.vmem [shape: bf16[4,16], index: 5, kind: input, shape index: {}]   ;;  %s3781_s6 = inlined_call_operand.vmem [shape: f32[1,16], index: 6, kind: input, shape index: {}]   ;;  %s3782_s7 = inlined_call_operand.hbm [shape: f32[2,16,16,16], index: 7, kind: output, shape index: {}]  }
   0x1   :  { %14 = vsyncpa [#allocation3 + $0x1], 0 }
   0x2   :  { %15 = vsyncpa [#allocation4], 0 }
   0x3   :  { %17 = vsyncpa [#allocation4 + $0x1], 0  ;;  %s2584_s24 = smov 0   ;;  %s2586_s25 = smov 0  }
   0x4   :  { %s2588_s26 = smov 0   ;;  %s2590_s27 = smov 0  }
   0x5 LB: > { %s2605_s28 = sadd.s32 4294967295, %s2528_s27   ;;  %s2108_s29 = sadd.s32 4294967294, %s2528_s27   ;;  %s2528_s27 = sphi %s2590_s27, %s3836_s27   ;;  %s2524_s26 = sphi %s2588_s26, %s3835_s26   ;;  %s2520_s25 = sphi %s2586_s25, %s3834_s25   ;;  %s2516_s24 = sphi %s2584_s24, %s3833_s24  }
   0x6   : > { %s2609_s30 = sadd.s32 1, %s2528_s27   ;;  %s30_s8 = sadd.s32 1, %s2524_s26 }
   0x7   : > { %s27_s9 = ssub.s32 %s2528_s27, %s2609_s30  ;;  %p37_p0 = scmp.ne.s32.totalorder %s2524_s26, %s2520_s25 }
   0x8   : > { %p28_p1 = scmp.eq.s32.totalorder %s27_s9, 0  ;;  %p38_p2 = scmp.eq.s32.totalorder %s2528_s27, 0 }
   0x9   : > { %p43_p3 = scmp.ne.s32.totalorder %s2520_s25, %s2516_s24  ;;  %p44_p4 = scmp.eq.s32.totalorder %s2605_s28, 0 }
   0xa   : > { %s2621_s10 = scalar_select %p28_p1, %s2524_s26, %s30_s8  }
   0xb   : > { %p2623_p5 = por %p38_p2, %p37_p0  ;;  %p2627_p6 = por %p44_p4, %p43_p3 }
   0xc   : > { %p193_p7 = scmp.eq.s32.totalorder %s2605_s28, 1  ;;  %p199_p8 = scmp.eq.s32.totalorder %s2108_s29, 1 }
   0xd   : > { %s3791_s12 = scalar_select %p2627_p6, 1, 0 }
   0xe   : > { %p2354_p10 = scmp.lt.s32.totalorder %s2528_s27, 2  ;;  %p2634_p11 = por %p193_p7, %p37_p0 }
   0xf   : > { %p2638_p12 = por %p199_p8, %p43_p3  ;;  %s237_s15 = sand.u32 1, %s2524_s26  }
  0x10   : > { %s3792_s13 = scalar_select %p2634_p11, 1, 0 }
  0x11   : > { %s3793_s14 = scalar_select %p2638_p12, 1, 0 }
  0x12   : > { %s2177_s16 = sshll.u32 %s2528_s27, 12  ;;  %s2111_s17 = sshll.u32 %s237_s15, 8 }
  0x13   : > { %s2647_s20 = scalar_lea.hbm %s3775_s0, %s2177_s16  ;;  %s241_s21 = scalar_lea.vmem [#allocation2], %s2111_s17 }
  0x14   : > { %s248_s22 = sshll.u32 %s241_s21, 4  ;;  %p2651_p13 = pnand %p2354_p10, %p2623_p5  ;;  %s2655_s22 = int_to_ptr.vmem [resolvable:$true] %s248_s22 }
  0x15   : > { %s2657_s29 = scalar_lea.sflag [#allocation3], %s237_s15  ;;  %s2436_s8 = scalar_lea.hbm %s2647_s20, 4096 }
  0x16   : > { %p2437_p0 = scmp.ne.s32.totalorder %s2647_s20, %s2436_s8  ;;  %p2438_p1 = pneg %p2651_p13 }
  0x17   : > { %s2441_s17 = scalar_lea.hbm %s3775_s0, 8192  ;;  %p2442_p4 = scmp.lt.s32.totalorder %s2647_s20, %s3775_s0 }
  0x18   : > { %p2439_p2 = pnand %p2438_p1, %p2437_p0  ;;  %p2443_p5 = scmp.lt.s32.totalorder %s2441_s17, %s2436_s8 }
  0x1a   : > { %p2440_p3 = pneg %p2439_p2  ;;  %p2444_p7 = por %p2443_p5, %p2442_p4 }
  0x1c   : > { %p2445_p8 = pnand %p2444_p7, %p2440_p3 }
  0x1e   : > { %2448 = shalt.err (!%p2445_p8)
}
  0x1f   : > { %s2449_s15 = scalar_lea.vmem %s2655_s22, 4096  ;;  %s2530_s19 = smov [#allocation2]  }
  0x20   : > { %p2450_p10 = scmp.ne.s32.totalorder %s2655_s22, %s2449_s15  ;;  %s2454_s21 = sshll.u32 %s2530_s19, 4  ;;  %s2455_s21 = int_to_ptr.vmem [resolvable:$false] %s2454_s21 }
  0x21   : > { %s2456_s9 = scalar_lea.vmem %s2455_s21, 8192  ;;  %p2457_p2 = scmp.lt.s32.totalorder %s2655_s22, %s2455_s21 }
  0x22   : > { %p2452_p9 = pnand %p2450_p10, %p2438_p1  ;;  %p2458_p12 = scmp.lt.s32.totalorder %s2456_s9, %s2449_s15 }
  0x24   : > { %p2453_p0 = pneg %p2452_p9  ;;  %p2459_p11 = por %p2458_p12, %p2457_p2 }
  0x26   : > { %p2460_p6 = pnand %p2459_p11, %p2453_p0 }
  0x28   : > { %2463 = shalt.err (!%p2460_p6)
}
  0x29   : > { %s2531_s8 = smov 128   ;;  %s2532_s16 = smov 8  }
  0x2a   : > { %2349 = dma.hbm_to_vmem [thread:$0]  (!%p2651_p13), %s2647_s20, 4096, %s2655_s22, %s2657_s29, %s2531_s8, %s2531_s8, %s2532_s16  }
  0x2b   : > { %p2114_p9 = scmp.ge.s32.totalorder %s2528_s27, 1  ;;  %p256_p1 = scmp.lt.s32.totalorder %s2528_s27, 3 }
  0x2d   : > { %p257_p3 = pnand %p2114_p9, %p256_p1 }
  0x2f   : > { %260 = sbr.rel (%p257_p3) target bundleno = 1054 (0x41e), region = 48 }
  0x34   : > { %s2681_s17 = sand.u32 1, %s2520_s25   ;;  %p3795_p6 = scmp.ne.s32.totalorder %s3791_s12, 0 }
  0x35   : > { %s3785_s11 = sshll.u32 %s2681_s17, 8  ;;  %s263_s18 = scalar_lea.sflag [#allocation3], %s2681_s17 }
  0x36   : > { %s2687_s15 = scalar_lea.vmem [#allocation2], %s3785_s11 }
  0x37   : > { %2507 = dma.done.wait (%p3795_p6), %s263_s18, 4096  }
  0x38   : > { %2509 = vsyncadd (%p3795_p6), %s263_s18, 4294963200  ;;  %v2400_v0 = vld [vmem:[%s3776_s1] sm:$0xff]   ;;  %v299_v2 = vld [vmem:[%s2687_s15 + $0x8] sm:$0xff]  ;;  %vm361_vm0 = vcmask 130048   ;;  %v3786_v49 = vmov 0   ;;  %vm826_vm1 = vcmask 1047552  }
  0x39   : > { %v298_v1 = vld [vmem:[%s2687_s15] sm:$0xff]  ;;  %2232 = vmatprep.subr.bf16.mxu0 %v2400_v0  ;;  %2338 = vmatprep.subr.bf16.mxu1 %v2400_v0  ;;  %v315_v5 = vld [vmem:[%s2687_s15 + $0x88] sm:$0xff]  ;;  %v300_v6 = vld [vmem:[%s2687_s15 + $0x10] sm:$0xff]  ;;  %v775_v50 = vrot.slane %v3786_v49, 1  ;;  %vm827_vm2 = vsmask.f32 7424 }
  0x3a   : > { %v314_v3 = vld [vmem:[%s2687_s15 + $0x80] sm:$0xff]  ;;  %v330_v4 = vpack.c.bf16 %v299_v2, %v298_v1  ;;  %v301_v7 = vld [vmem:[%s2687_s15 + $0x18] sm:$0xff]  ;;  %2233 = vmatpush3.bf16.msra.mxu0 %v2400_v0  ;;  %2339 = vmatpush3.bf16.msra.mxu1 %v2400_v0  ;;  %v316_v10 = vld [vmem:[%s2687_s15 + $0x90] sm:$0xff]  ;;  %s2534_s12 = smov 4   ;;  %s2535_s23 = smov 8   ;;  %vm755_vm4 = vcmask 1040384  }
  0x3b   : > { %v338_v8 = vpack.c.bf16 %v315_v5, %v314_v3  ;;  %v331_v9 = vpack.c.bf16 %v301_v7, %v300_v6  ;;  %v317_v11 = vld [vmem:[%s2687_s15 + $0x98] sm:$0xff]  ;;  %v302_v12 = vld [vmem:[%s2687_s15 + $0x20] sm:$0xff]  ;;  %v303_v14 = vld [vmem:[%s2687_s15 + $0x28] sm:$0xff]  ;;  %862 = vrot.lane.b32.xlu0 %v3786_v49, %s2534_s12  ;;  %s2536_s21 = smov 28   ;;  %s2537_s9 = smov 16   ;;  %vm1492_vm7 = vcmask 1041408  }
  0x3c   : > { %2234 = vmatprep.mubr.msk.bf16.mxu0 %vm361_vm0, %v330_v4  ;;  %v339_v13 = vpack.c.bf16 %v317_v11, %v316_v10  ;;  %v332_v15 = vpack.c.bf16 %v303_v14, %v302_v12  ;;  %v318_v16 = vld [vmem:[%s2687_s15 + $0xa0] sm:$0xff]  ;;  %v319_v17 = vld [vmem:[%s2687_s15 + $0xa8] sm:$0xff]  ;;  %v304_v18 = vld [vmem:[%s2687_s15 + $0x30] sm:$0xff]  ;;  %vm756_vm5 = vsmask.f32 256  ;;  %s2538_s8 = smov 24  }
  0x3d   : > { %2250 = vmatprep.mubr.msk.bf16.mxu1 %vm361_vm0, %v338_v8  ;;  %2235 = vmatmul.mubr.msk.bf16.vlgmr.msra.gmra.mxu0 %vm361_vm0, %v331_v9  ;;  %v305_v19 = vld [vmem:[%s2687_s15 + $0x38] sm:$0xff]  ;;  %v340_v20 = vpack.c.bf16 %v319_v17, %v318_v16  ;;  %v320_v21 = vld [vmem:[%s2687_s15 + $0xb0] sm:$0xff]  ;;  %v306_v23 = vld [vmem:[%s2687_s15 + $0x40] sm:$0xff]  ;;  %s2539_s16 = smov 12   ;;  %s2540_s18 = smov 32   ;;  %vm1153_vm8 = vcmask 31744  }
  0x3e   : > { %2251 = vmatmul.mubr.msk.bf16.vlgmr.msra.gmra.mxu1 %vm361_vm0, %v339_v13  ;;  %2238 = vmatprep.mubr.msk.bf16.mxu0 %vm361_vm0, %v332_v15  ;;  %v321_v22 = vld [vmem:[%s2687_s15 + $0xb8] sm:$0xff]  ;;  %v307_v24 = vld [vmem:[%s2687_s15 + $0x48] sm:$0xff]  ;;  %v322_v25 = vld [vmem:[%s2687_s15 + $0xc0] sm:$0xff]  ;;  %v333_v27 = vpack.c.bf16 %v305_v19, %v304_v18  ;;  %s2541_s20 = smov 20   ;;  %vm1202_vm9 = vcmask 64512   ;;  %vm1235_vm10 = vcmask 97280  }
  0x3f   : > { %2254 = vmatprep.mubr.msk.bf16.mxu1 %vm361_vm0, %v340_v20  ;;  %v323_v26 = vld [vmem:[%s2687_s15 + $0xc8] sm:$0xff]  ;;  %v341_v28 = vpack.c.bf16 %v321_v22, %v320_v21  ;;  %v334_v29 = vpack.c.bf16 %v307_v24, %v306_v23  ;;  %v308_v31 = vld [vmem:[%s2687_s15 + $0x50] sm:$0xff]  ;;  %v309_v32 = vld [vmem:[%s2687_s15 + $0x58] sm:$0xff]  ;;  %vm1300_vm11 = vcmask 162816   ;;  %vm1333_vm12 = vcmask 195584   ;;  %s2178_s19 = sshll.u32 %s2605_s28, 12 }
  0x40   : > { %v342_v30 = vpack.c.bf16 %v323_v26, %v322_v25  ;;  %v324_v33 = vld [vmem:[%s2687_s15 + $0xd0] sm:$0xff]  ;;  %v325_v34 = vld [vmem:[%s2687_s15 + $0xd8] sm:$0xff]  ;;  %v310_v35 = vld [vmem:[%s2687_s15 + $0x60] sm:$0xff]  ;;  %v335_v39 = vpack.c.bf16 %v309_v32, %v308_v31  ;;  %vm1366_vm13 = vcmask 228352   ;;  %vm1399_vm14 = vcmask 261120   ;;  %s2022_s28 = scalar_lea.sflag [#allocation4], %s2681_s17 }
  0x41   : > { %v311_v36 = vld [vmem:[%s2687_s15 + $0x68] sm:$0xff]  ;;  %v326_v37 = vld [vmem:[%s2687_s15 + $0xe0] sm:$0xff]  ;;  %v343_v40 = vpack.c.bf16 %v325_v34, %v324_v33  ;;  %v312_v43 = vld [vmem:[%s2687_s15 + $0x70] sm:$0xff]  ;;  %vm1459_vm15 = vcmask 293888   ;;  %p3830_p12 = scmp.ne.s32.totalorder %s3792_s13, 0 }
  0x42   : > { %v327_v38 = vld [vmem:[%s2687_s15 + $0xe8] sm:$0xff]  ;;  %v336_v41 = vpack.c.bf16 %v311_v36, %v310_v35  ;;  %v313_v44 = vld [vmem:[%s2687_s15 + $0x78] sm:$0xff]  ;;  %v328_v45 = vld [vmem:[%s2687_s15 + $0xf0] sm:$0xff] }
  0x43   : > { %v344_v42 = vpack.c.bf16 %v327_v38, %v326_v37  ;;  %v329_v46 = vld [vmem:[%s2687_s15 + $0xf8] sm:$0xff]  ;;  %v337_v47 = vpack.c.bf16 %v313_v44, %v312_v43  ;;  %vm2745_vm3 = vmand %vm826_vm1, %vm827_vm2  ;;  %v2760_v54 = vld [vmem:[%s3777_s2] ss:$0 sm:$0xff] }
  0x44   : > { %v345_v48 = vpack.c.bf16 %v329_v46, %v328_v45  ;;  %v2751_v52 = vsel %vm2745_vm3, %v775_v50, 0  ;;  %vm2788_vm6 = vmand %vm755_vm4, %vm756_vm5 }
  0x45   : > { %2239 = vmatmul.mubr.msk.bf16.gmra.mxu0 %vm361_vm0, %v333_v27  ;;  %910 = vrot.lane.b32.xlu1 %v2751_v52, %s2535_s23 }
  0x46   : > { %2255 = vmatmul.mubr.msk.bf16.gmra.mxu1 %vm361_vm0, %v341_v28  ;;  %2242 = vmatprep.mubr.msk.bf16.mxu0 %vm361_vm0, %v334_v29 }
  0x47   : > { %2258 = vmatprep.mubr.msk.bf16.mxu1 %vm361_vm0, %v342_v30 }
  0x4d   : > { %2243 = vmatmul.mubr.msk.bf16.gmra.mxu0 %vm361_vm0, %v335_v39 }
  0x4e   : > { %2259 = vmatmul.mubr.msk.bf16.gmra.mxu1 %vm361_vm0, %v343_v40  ;;  %2246 = vmatprep.mubr.msk.bf16.mxu0 %vm361_vm0, %v336_v41 }
  0x4f   : > { %2262 = vmatprep.mubr.msk.bf16.mxu1 %vm361_vm0, %v344_v42 }
  0x55   : > { %2247 = vmatmul.mubr.msk.bf16.gmra.mxu0 %vm361_vm0, %v337_v47 }
  0x56   : > { %2263 = vmatmul.mubr.msk.bf16.gmra.mxu1 %vm361_vm0, %v345_v48 }
  0xfd   : > { %v2236_v53 = vpop.f32.mrf.mxu0 }
  0xfe   : > { %v2252_v55 = vpop.f32.mrf.mxu1  ;;  %v453_v58 = vadd.f32 %v2236_v53, %v2760_v54 }
  0xff   : > { %v444_v56 = vpop.f32.mrf.mxu0  ;;  %v517_v61 = vadd.f32 %v2252_v55, %v2760_v54 }
 0x100   : > { %v508_v57 = vpop.f32.mrf.mxu1  ;;  %v573_v1 = vmax.f32 %v453_v58, 0.0  ;;  %v445_v7 = vadd.f32 %v2760_v54, %v444_v56 }
 0x101   : > { %v2237_v59 = vpop.f32.mrf.mxu0  ;;  %v589_v3 = vmax.f32 %v517_v61, 0.0  ;;  %v509_v15 = vadd.f32 %v2760_v54, %v508_v57 }
 0x102   : > { %v2253_v60 = vpop.f32.mrf.mxu1  ;;  %v456_v62 = vadd.f32 %v2237_v59, %v2760_v54  ;;  %v571_v11 = vmax.f32 %v445_v7, 0.0 }
 0x103   : > { %v520_v63 = vadd.f32 %v2253_v60, %v2760_v54  ;;  %v447_v0 = vpop.f32.mrf.mxu0  ;;  %v587_v19 = vmax.f32 %v509_v15, 0.0 }
 0x104   : > { %v574_v2 = vmax.f32 %v456_v62, 0.0  ;;  %v448_v6 = vadd.f32 %v2760_v54, %v447_v0  ;;  %v511_v10 = vpop.f32.mrf.mxu1 }
 0x105   : > { %v590_v5 = vmax.f32 %v520_v63, 0.0  ;;  %v512_v13 = vadd.f32 %v2760_v54, %v511_v10  ;;  %v2240_v27 = vpop.f32.mrf.mxu0 }
 0x106   : > { %v604_v4 = vpack.c.bf16 %v574_v2, %v573_v1  ;;  %v572_v9 = vmax.f32 %v448_v6, 0.0  ;;  %v2256_v35 = vpop.f32.mrf.mxu1  ;;  %v469_v36 = vadd.f32 %v2240_v27, %v2760_v54 }
 0x107   : > { %v612_v8 = vpack.c.bf16 %v590_v5, %v589_v3  ;;  %v588_v16 = vmax.f32 %v512_v13, 0.0  ;;  %v460_v31 = vpop.f32.mrf.mxu0  ;;  %v533_v46 = vadd.f32 %v2256_v35, %v2760_v54 }
 0x108   : > { %1089 = vrot.lane.b32.xlu0 %v604_v4, %s2536_s21  ;;  %993 = vrot.lane.b32.xlu1 %v604_v4, %s2537_s9  ;;  %v2772_v12 = vpack.c.bf16 %v572_v9, %v571_v11  ;;  %v634_v14 = vshrl.u32 %v604_v4, 16  ;;  %v637_v18 = vshll.u32 %v604_v4, 16  ;;  %v524_v40 = vpop.f32.mrf.mxu1  ;;  %v577_v41 = vmax.f32 %v469_v36, 0.0  ;;  %v2401_v36 = vld [vmem:[%s3778_s3 + $0x10] ss:$0 sps:$4 sm:$0x33]  }
 0x109   : > { %v2782_v20 = vpack.c.bf16 %v588_v16, %v587_v19  ;;  %v690_v26 = vshrl.u32 %v612_v8, 16  ;;  %v693_v30 = vshll.u32 %v612_v8, 16  ;;  %v2241_v34 = vpop.f32.mrf.mxu0  ;;  %v593_v50 = vmax.f32 %v533_v46, 0.0  ;;  %2340 = vmatprep.subr.msk.bf16.mxu1 %vm1492_vm7, %v2401_v36 }
 0x10a   : > { %v636_v17 = vrot.slane %v634_v14, 7  ;;  %v779_v22 = vrot.slane %v637_v18, 1  ;;  %v472_v37 = vadd.f32 %v2241_v34, %v2760_v54  ;;  %v2257_v44 = vpop.f32.mrf.mxu1  ;;  %v627_v48 = vshrl.u32 %v2772_v12, 16 }
 0x10b   : > { %v692_v29 = vrot.slane %v690_v26, 7  ;;  %v795_v33 = vrot.slane %v693_v30, 1  ;;  %v536_v47 = vadd.f32 %v2257_v44, %v2760_v54  ;;  %v630_v56 = vshll.u32 %v2772_v12, 16  ;;  %v463_v2 = vpop.f32.mrf.mxu0 }
 0x10c   : > { %1105 = vrot.lane.b32.xlu0 %v612_v8, %s2536_s21  ;;  %866 = vrot.lane.b32.xlu1 %v604_v4, %s2534_s12  ;;  %v639_v21 = vor.u32 %v637_v18, %v636_v17  ;;  %v780_v25 = vor.u32 %v779_v22, %v634_v14  ;;  %v578_v42 = vmax.f32 %v472_v37, 0.0  ;;  %v629_v55 = vrot.slane %v627_v48, 7 }
 0x10d   : > { %v695_v32 = vor.u32 %v693_v30, %v692_v29  ;;  %v796_v39 = vor.u32 %v795_v33, %v690_v26  ;;  %v594_v53 = vmax.f32 %v536_v47, 0.0  ;;  %v777_v59 = vrot.slane %v630_v56, 1  ;;  %v2244_v29 = vpop.f32.mrf.mxu0 }
 0x10e   : > { %v2794_v24 = vsel %vm2788_vm6, 0, %v639_v21  ;;  %v831_v28 = vsel %vm2745_vm3, %v780_v25, 0  ;;  %v606_v45 = vpack.c.bf16 %v578_v42, %v577_v41  ;;  %v632_v58 = vor.u32 %v630_v56, %v629_v55 }
 0x10f   : > { %v2811_v38 = vsel %vm2788_vm6, 0, %v695_v32  ;;  %v839_v43 = vsel %vm2745_vm3, %v796_v39, 0  ;;  %v2829_v57 = vpack.c.bf16 %v594_v53, %v593_v50  ;;  %v683_v60 = vshrl.u32 %v2782_v20, 16  ;;  %v2895_v33 = vpop.f32.mrf.mxu0  ;;  %v2403_v53 = vld [vmem:[%s3778_s3] sm:$0xff]  }
 0x110   : > { %1009 = vrot.lane.b32.xlu1 %v612_v8, %s2537_s9  ;;  %864 = vrot.lane.b32.xlu0 %v2772_v12, %s2534_s12  ;;  %v686_v61 = vshll.u32 %v2782_v20, 16  ;;  %v2839_v62 = vsel %vm2788_vm6, 0, %v632_v58  ;;  %v778_v63 = vor.u32 %v777_v59, %v627_v48  ;;  %v461_v6 = vadd.f32 %v2760_v54, %v460_v31 }
 0x111   : > { %v685_v0 = vrot.slane %v683_v60, 7  ;;  %v464_v7 = vadd.f32 %v2760_v54, %v463_v2  ;;  %v525_v14 = vadd.f32 %v2760_v54, %v524_v40  ;;  %v648_v16 = vshrl.u32 %v606_v45, 16  ;;  %v2245_v37 = vpop.f32.mrf.mxu0 }
 0x112   : > { %v793_v1 = vrot.slane %v686_v61, 1  ;;  %v830_v3 = vsel %vm2745_vm3, %v778_v63, 0  ;;  %v575_v10 = vmax.f32 %v461_v6, 0.0  ;;  %v707_v32 = vshll.u32 %v2829_v57, 16  ;;  %v2946_v6 = vpop.permute.xlu0 %862 }
 0x113   : > { %v688_v4 = vor.u32 %v686_v61, %v685_v0  ;;  %v576_v11 = vmax.f32 %v464_v7, 0.0  ;;  %v591_v17 = vmax.f32 %v525_v14, 0.0  ;;  %v650_v19 = vrot.slane %v648_v16, 7  ;;  %v2948_v7 = vpop.permute.xlu1 %910 }
 0x114   : > { %882 = vrot.lane.b32.xlu1 %v612_v8, %s2534_s12  ;;  %991 = vrot.lane.b32.xlu0 %v2772_v12, %s2537_s9  ;;  %v794_v5 = vor.u32 %v793_v1, %v683_v60  ;;  %v527_v12 = vpop.f32.mrf.mxu1  ;;  %v799_v35 = vrot.slane %v707_v32, 1  ;;  %v485_v40 = vadd.f32 %v2244_v29, %v2760_v54  ;;  %v488_v41 = vadd.f32 %v2245_v37, %v2760_v54 }
 0x115   : > { %v2853_v8 = vsel %vm2788_vm6, 0, %v688_v4  ;;  %v2863_v13 = vpack.c.bf16 %v576_v11, %v575_v10  ;;  %v528_v15 = vadd.f32 %v2760_v54, %v527_v12  ;;  %v1494_v44 = vsel %vm1492_vm7, %v2401_v36, 0 }
 0x116   : > { %v838_v9 = vsel %vm2745_vm3, %v794_v5, 0  ;;  %v2260_v39 = vpop.f32.mrf.mxu1  ;;  %2267 = vmatpush3.bf16.msra.mxu1 %v1494_v44  ;;  %v581_v47 = vmax.f32 %v485_v40, 0.0  ;;  %v582_v48 = vmax.f32 %v488_v41, 0.0 }
 0x117   : > { %v592_v18 = vmax.f32 %v528_v15, 0.0  ;;  %v641_v59 = vshrl.u32 %v2863_v13, 16  ;;  %v644_v60 = vshll.u32 %v2863_v13, 16  ;;  %v479_v15 = vpop.f32.mrf.mxu0 }
 0x118   : > { %1103 = vrot.lane.b32.xlu1 %v2782_v20, %s2536_s21  ;;  %1007 = vrot.lane.b32.xlu0 %v2782_v20, %s2537_s9  ;;  %v2917_v46 = vpop.f32.mrf.mxu1  ;;  %v2926_v56 = vpack.c.bf16 %v582_v48, %v581_v47 }
 0x119   : > { %v2874_v21 = vpack.c.bf16 %v592_v18, %v591_v17  ;;  %v643_v0 = vrot.slane %v641_v59, 7  ;;  %v781_v1 = vrot.slane %v644_v60, 1  ;;  %v477_v18 = vadd.f32 %v2760_v54, %v2895_v33 }
 0x11a   : > { %v2261_v55 = vpop.f32.mrf.mxu1  ;;  %v662_v44 = vshrl.u32 %v2926_v56, 16 }
 0x11b   : > { %v552_v58 = vadd.f32 %v2261_v55, %v2760_v54  ;;  %v782_v4 = vor.u32 %v781_v1, %v641_v59  ;;  %v697_v5 = vshrl.u32 %v2874_v21, 16  ;;  %v700_v12 = vshll.u32 %v2874_v21, 16 }
 0x11c   : > { %880 = vrot.lane.b32.xlu1 %v2782_v20, %s2534_s12  ;;  %1057 = vrot.lane.b32.xlu0 %v2794_v24, %s2538_s8  ;;  %v651_v20 = vshll.u32 %v606_v45, 16  ;;  %v664_v48 = vrot.slane %v662_v44, 7 }
 0x11d   : > { %v598_v63 = vmax.f32 %v552_v58, 0.0  ;;  %v832_v10 = vsel %vm2745_vm3, %v782_v4, 0  ;;  %v699_v11 = vrot.slane %v697_v5, 7  ;;  %v797_v17 = vrot.slane %v700_v12, 1 }
 0x11e   : > { %v653_v22 = vor.u32 %v651_v20, %v650_v19  ;;  %v783_v25 = vrot.slane %v651_v20, 1  ;;  %v480_v19 = vadd.f32 %v2760_v54, %v479_v15 }
 0x120   : > { %960 = vrot.lane.b32.xlu1 %v2794_v24, %s2539_s16  ;;  %1121 = vrot.lane.b32.xlu0 %v831_v28, %s2540_s18  ;;  %v2882_v26 = vsel %vm2788_vm6, 0, %v653_v22  ;;  %v784_v27 = vor.u32 %v783_v25, %v648_v16  ;;  %v702_v16 = vor.u32 %v700_v12, %v699_v11  ;;  %v798_v25 = vor.u32 %v797_v17, %v697_v5 }
 0x122   : > { %v833_v30 = vsel %vm2745_vm3, %v784_v27, 0  ;;  %v2976_v22 = vsel %vm2788_vm6, 0, %v702_v16  ;;  %v579_v27 = vmax.f32 %v477_v18, 0.0 }
 0x124   : > { %1026 = vrot.lane.b32.xlu1 %v831_v28, %s2541_s20  ;;  %914 = vrot.lane.b32.xlu0 %v831_v28, %s2535_s23  ;;  %v704_v28 = vshrl.u32 %v2829_v57, 16 }
 0x126   : > { %v706_v31 = vrot.slane %v704_v28, 7 }
 0x128   : > { %976 = vrot.lane.b32.xlu1 %v2811_v38, %s2539_s16  ;;  %1073 = vrot.lane.b32.xlu0 %v2811_v38, %s2538_s8  ;;  %v709_v34 = vor.u32 %v707_v32, %v706_v31  ;;  %v543_v31 = vpop.f32.mrf.mxu1  ;;  %v840_v32 = vsel %vm2745_vm3, %v798_v25, 0 }
 0x12a   : > { %v2907_v42 = vsel %vm2788_vm6, 0, %v709_v34  ;;  %v541_v34 = vadd.f32 %v2760_v54, %v2917_v46 }
 0x12c   : > { %1042 = vrot.lane.b32.xlu1 %v839_v43, %s2541_s20  ;;  %1137 = vrot.lane.b32.xlu0 %v839_v43, %s2540_s18 }
 0x130   : > { %997 = vrot.lane.b32.xlu1 %v606_v45, %s2537_s9  ;;  %930 = vrot.lane.b32.xlu0 %v839_v43, %s2535_s23  ;;  %v800_v43 = vor.u32 %v799_v35, %v704_v28  ;;  %v580_v28 = vmax.f32 %v480_v19, 0.0  ;;  %v544_v35 = vadd.f32 %v2760_v54, %v543_v31 }
 0x132   : > { %v841_v50 = vsel %vm2745_vm3, %v800_v43, 0  ;;  %v2989_v33 = vpack.c.bf16 %v580_v28, %v579_v27  ;;  %v596_v40 = vmax.f32 %v544_v35, 0.0 }
 0x134   : > { %870 = vrot.lane.b32.xlu1 %v606_v45, %s2534_s12  ;;  %1093 = vrot.lane.b32.xlu0 %v606_v45, %s2536_s21  ;;  %v2402_v45 = vld [vmem:[%s3778_s3 + $0x8] sm:$0xff]   ;;  %v658_v31 = vshll.u32 %v2989_v33, 16 }
 0x135   : > { %2268 = vmatprep.subr.bf16.mxu1 %v2402_v45 }
 0x136   : > { %2269 = vmatpush3.bf16.msra.mxu1 %v2402_v45 }
 0x137   : > { %2270 = vmatprep.subr.bf16.mxu1 %v2403_v53 }
 0x138   : > { %1013 = vrot.lane.b32.xlu1 %v2829_v57, %s2537_s9  ;;  %1109 = vrot.lane.b32.xlu0 %v2829_v57, %s2536_s21 }
 0x13a   : > { %2271 = vmatpush3.bf16.msra.mxu1 %v2403_v53 }
 0x13c   : > { %886 = vrot.lane.b32.xlu1 %v2829_v57, %s2534_s12  ;;  %958 = vrot.lane.b32.xlu0 %v2839_v62, %s2539_s16  ;;  %v549_v57 = vadd.f32 %v2260_v39, %v2760_v54  ;;  %v595_v39 = vmax.f32 %v541_v34, 0.0 }
 0x13e   : > { %v597_v61 = vmax.f32 %v549_v57, 0.0  ;;  %v3010_v45 = vpack.c.bf16 %v596_v40, %v595_v39  ;;  %v622_v40 = vrot.slane %v3786_v49, 7 }
 0x140   : > { %912 = vrot.lane.b32.xlu1 %v830_v3, %s2535_s23  ;;  %1024 = vrot.lane.b32.xlu0 %v830_v3, %s2541_s20  ;;  %v2939_v2 = vpack.c.bf16 %v598_v63, %v597_v61  ;;  %v646_v3 = vor.u32 %v644_v60, %v643_v0 }
 0x142   : > { %v718_v59 = vshrl.u32 %v2939_v2, 16 }
 0x144   : > { %1071 = vrot.lane.b32.xlu1 %v2853_v8, %s2538_s8  ;;  %1135 = vrot.lane.b32.xlu0 %v838_v9, %s2540_s18  ;;  %v720_v1 = vrot.slane %v718_v59, 7 }
 0x148   : > { %928 = vrot.lane.b32.xlu1 %v838_v9, %s2535_s23  ;;  %974 = vrot.lane.b32.xlu0 %v2853_v8, %s2539_s16 }
 0x14c   : > { %1091 = vrot.lane.b32.xlu1 %v2863_v13, %s2536_s21  ;;  %1040 = vrot.lane.b32.xlu0 %v838_v9, %s2541_s20  ;;  %v2952_v9 = vsel %vm2788_vm6, 0, %v646_v3  ;;  %v721_v3 = vshll.u32 %v2939_v2, 16 }
 0x14e   : > { %v723_v12 = vor.u32 %v721_v3, %v720_v1  ;;  %v803_v15 = vrot.slane %v721_v3, 1 }
 0x150   : > { %868 = vrot.lane.b32.xlu1 %v2863_v13, %s2534_s12  ;;  %995 = vrot.lane.b32.xlu0 %v2863_v13, %s2537_s9  ;;  %v3061_v27 = vsel %vm2788_vm6, 0, %v723_v12  ;;  %v804_v28 = vor.u32 %v803_v15, %v718_v59 }
 0x151   : > { %3806 = vst [vmem:[#allocation14_spill] sm:$0xff] %v3061_v27 }
 0x154   : > { %1107 = vrot.lane.b32.xlu1 %v2874_v21, %s2536_s21  ;;  %1011 = vrot.lane.b32.xlu0 %v2874_v21, %s2537_s9 }
 0x158   : > { %884 = vrot.lane.b32.xlu1 %v2874_v21, %s2534_s12  ;;  %1061 = vrot.lane.b32.xlu0 %v2882_v26, %s2538_s8 }
 0x15c   : > { %964 = vrot.lane.b32.xlu1 %v2882_v26, %s2539_s16  ;;  %1125 = vrot.lane.b32.xlu0 %v833_v30, %s2540_s18 }
 0x160   : > { %1030 = vrot.lane.b32.xlu1 %v833_v30, %s2541_s20  ;;  %918 = vrot.lane.b32.xlu0 %v833_v30, %s2535_s23 }
 0x164   : > { %980 = vrot.lane.b32.xlu1 %v2907_v42, %s2539_s16  ;;  %1077 = vrot.lane.b32.xlu0 %v2907_v42, %s2538_s8 }
 0x168   : > { %1046 = vrot.lane.b32.xlu1 %v841_v50, %s2541_s20  ;;  %1141 = vrot.lane.b32.xlu0 %v841_v50, %s2540_s18 }
 0x16c   : > { %1001 = vrot.lane.b32.xlu1 %v2926_v56, %s2537_s9  ;;  %934 = vrot.lane.b32.xlu0 %v841_v50, %s2535_s23  ;;  %v665_v50 = vshll.u32 %v2926_v56, 16 }
 0x16e   : > { %v667_v57 = vor.u32 %v665_v50, %v664_v48  ;;  %v787_v58 = vrot.slane %v665_v50, 1  ;;  %v655_v48 = vshrl.u32 %v2989_v33, 16  ;;  %v785_v50 = vrot.slane %v658_v31, 1 }
 0x170   : > { %874 = vrot.lane.b32.xlu1 %v2926_v56, %s2534_s12  ;;  %1097 = vrot.lane.b32.xlu0 %v2926_v56, %s2536_s21  ;;  %v2248_v56 = vpop.f32.mrf.mxu0  ;;  %v3036_v63 = vsel %vm2788_vm6, 0, %v667_v57  ;;  %v788_v0 = vor.u32 %v787_v58, %v662_v44  ;;  %v3074_v44 = vsel %vm2745_vm3, %v804_v28, 0 }
 0x171   : > { %3803 = vst [vmem:[#allocation11_spill] sm:$0xff] %v3036_v63  ;;  %v501_v17 = vadd.f32 %v2248_v56, %v2760_v54  ;;  %v3089_v56 = vsel %vm2788_vm6, 0, %v622_v40 }
 0x172   : > { %v3043_v4 = vpop.f32.mrf.mxu0  ;;  %v835_v11 = vsel %vm2745_vm3, %v788_v0, 0  ;;  %v786_v0 = vor.u32 %v785_v50, %v655_v48  ;;  %v1156_v1 = vsel %vm1153_vm8, %v3089_v56, %v2946_v6 }
 0x173   : > { %v1204_v6 = vsel %vm1202_vm9, %v1156_v1, %v2948_v7 }
 0x174   : > { %1017 = vrot.lane.b32.xlu1 %v2939_v2, %s2537_s9  ;;  %1113 = vrot.lane.b32.xlu0 %v2939_v2, %s2536_s21  ;;  %v2249_v16 = vpop.f32.mrf.mxu0  ;;  %v834_v12 = vsel %vm2745_vm3, %v786_v0, 0 }
 0x175   : > { %v504_v18 = vadd.f32 %v2249_v16, %v2760_v54  ;;  %v711_v16 = vshrl.u32 %v3010_v45, 16 }
 0x176   : > { %v495_v0 = vpop.f32.mrf.mxu0 }
 0x177   : > { %v586_v34 = vmax.f32 %v504_v18, 0.0 }
 0x178   : > { %1059 = vrot.lane.b32.xlu1 %v2952_v9, %s2538_s8  ;;  %1123 = vrot.lane.b32.xlu0 %v832_v10, %s2540_s18 }
 0x17a   : > { %v2960_v13 = vpop.permute.xlu0 %1089  ;;  %v2962_v14 = vpop.permute.xlu1 %993 }
 0x17c   : > { %916 = vrot.lane.b32.xlu1 %v832_v10, %s2535_s23  ;;  %962 = vrot.lane.b32.xlu0 %v2952_v9, %s2539_s16 }
 0x17e   : > { %v2970_v20 = vpop.permute.xlu0 %1105  ;;  %v2972_v21 = vpop.permute.xlu1 %866 }
 0x17f   : > { %3800 = vst [vmem:[#allocation8_spill] sm:$0xff] %v2970_v20 }
 0x180   : > { %1075 = vrot.lane.b32.xlu1 %v2976_v22, %s2538_s8  ;;  %1028 = vrot.lane.b32.xlu0 %v832_v10, %s2541_s20 }
 0x182   : > { %v2981_v29 = vpop.permute.xlu1 %1009  ;;  %v2983_v30 = vpop.permute.xlu0 %864 }
 0x184   : > { %932 = vrot.lane.b32.xlu1 %v840_v32, %s2535_s23  ;;  %1139 = vrot.lane.b32.xlu0 %v840_v32, %s2540_s18 }
 0x186   : > { %v2994_v36 = vpop.permute.xlu1 %882  ;;  %v2996_v37 = vpop.permute.xlu0 %991 }
 0x188   : > { %1095 = vrot.lane.b32.xlu1 %v2989_v33, %s2536_s21  ;;  %978 = vrot.lane.b32.xlu0 %v2976_v22, %s2539_s16 }
 0x18a   : > { %v3002_v41 = vpop.permute.xlu1 %1103  ;;  %v3004_v43 = vpop.permute.xlu0 %1007 }
 0x18b   : > { %3801 = vst [vmem:[#allocation9_spill] sm:$0xff] %v3002_v41  ;;  %3802 = vst [vmem:[#allocation10_spill] sm:$0xff] %v3004_v43 }
 0x18c   : > { %872 = vrot.lane.b32.xlu1 %v2989_v33, %s2534_s12  ;;  %1044 = vrot.lane.b32.xlu0 %v840_v32, %s2541_s20  ;;  %v585_v32 = vmax.f32 %v501_v17, 0.0  ;;  %v714_v17 = vshll.u32 %v3010_v45, 16 }
 0x18e   : > { %v3012_v46 = vpop.permute.xlu1 %880  ;;  %v3014_v47 = vpop.permute.xlu0 %1057  ;;  %v3081_v57 = vpack.c.bf16 %v586_v34, %v585_v32  ;;  %v801_v40 = vrot.slane %v714_v17, 1 }
 0x18f   : > { %v3118_v34 = vpop.f32.mrf.mxu1 }
 0x190   : > { %1111 = vrot.lane.b32.xlu1 %v3010_v45, %s2536_s21  ;;  %999 = vrot.lane.b32.xlu0 %v2989_v33, %s2537_s9  ;;  %v657_v33 = vrot.slane %v655_v48, 7 }
 0x191   : > { %v556_v1 = vpop.f32.mrf.mxu1 }
 0x192   : > { %v3021_v53 = vpop.permute.xlu1 %960  ;;  %v3023_v55 = vpop.permute.xlu0 %1121  ;;  %v660_v15 = vor.u32 %v658_v31, %v657_v33 }
 0x194   : > { %888 = vrot.lane.b32.xlu1 %v3010_v45, %s2534_s12  ;;  %1015 = vrot.lane.b32.xlu0 %v3010_v45, %s2537_s9  ;;  %v3116_v31 = vsel %vm2788_vm6, 0, %v660_v15  ;;  %v713_v45 = vrot.slane %v711_v16, 7 }
 0x196   : > { %v3030_v60 = vpop.permute.xlu1 %1026  ;;  %v3032_v61 = vpop.permute.xlu0 %914  ;;  %v716_v15 = vor.u32 %v714_v17, %v713_v45 }
 0x198   : > { %968 = vrot.lane.b32.xlu1 %v3036_v63, %s2539_s16  ;;  %1065 = vrot.lane.b32.xlu0 %v3036_v63, %s2538_s8 }
 0x19a   : > { %v3045_v5 = vpop.permute.xlu1 %976  ;;  %v3047_v10 = vpop.permute.xlu0 %1073 }
 0x19b   : > { %3804 = vst [vmem:[#allocation12_spill] sm:$0xff] %v3047_v10 }
 0x19c   : > { %1034 = vrot.lane.b32.xlu1 %v835_v11, %s2541_s20  ;;  %1129 = vrot.lane.b32.xlu0 %v835_v11, %s2540_s18 }
 0x19e   : > { %v3055_v19 = vpop.permute.xlu1 %1042  ;;  %v3057_v25 = vpop.permute.xlu0 %1137 }
 0x19f   : > { %3805 = vst [vmem:[#allocation13_spill] sm:$0xff] %v3057_v25 }
 0x1a0   : > { %984 = vrot.lane.b32.xlu1 %v3061_v27, %s2539_s16  ;;  %922 = vrot.lane.b32.xlu0 %v835_v11, %s2535_s23 }
 0x1a2   : > { %v3067_v35 = vpop.permute.xlu1 %997  ;;  %v3069_v39 = vpop.permute.xlu0 %930 }
 0x1a4   : > { %1050 = vrot.lane.b32.xlu1 %v3074_v44, %s2541_s20  ;;  %1081 = vrot.lane.b32.xlu0 %v3061_v27, %s2538_s8 }
 0x1a6   : > { %v3083_v58 = vpop.permute.xlu1 %870  ;;  %v3085_v59 = vpop.permute.xlu0 %1093 }
 0x1a8   : > { %1005 = vrot.lane.b32.xlu1 %v3081_v57, %s2537_s9  ;;  %1101 = vrot.lane.b32.xlu0 %v3081_v57, %s2536_s21 }
 0x1aa   : > { %v3098_v3 = vpop.permute.xlu1 %1013  ;;  %v3100_v11 = vpop.permute.xlu0 %1109 }
 0x1ac   : > { %878 = vrot.lane.b32.xlu1 %v3081_v57, %s2534_s12  ;;  %1127 = vrot.lane.b32.xlu0 %v834_v12, %s2540_s18 }
 0x1ae   : > { %v3111_v18 = vpop.permute.xlu1 %886  ;;  %v959_v28 = vpop.permute.xlu0 %958 }
 0x1af   : > { %v1237_v32 = vsel %vm1235_vm10, %v1204_v6, %v959_v28  ;;  %v802_v6 = vor.u32 %v801_v40, %v711_v16  ;;  %v2265_v16 = vpop.f32.mrf.mxu1 }
 0x1b0   : > { %1063 = vrot.lane.b32.xlu1 %v3116_v31, %s2538_s8  ;;  %966 = vrot.lane.b32.xlu0 %v3116_v31, %s2539_s16  ;;  %v1269_v48 = vsel %vm361_vm0, %v1237_v32, %v2996_v37  ;;  %v493_v32 = vadd.f32 %v2760_v54, %v3043_v4  ;;  %v568_v41 = vadd.f32 %v2265_v16, %v2760_v54 }
 0x1b2   : > { %v3124_v7 = vpop.permute.xlu1 %912  ;;  %v1025_v50 = vpop.permute.xlu0 %1024  ;;  %v583_v4 = vmax.f32 %v493_v32, 0.0  ;;  %v602_v10 = vmax.f32 %v568_v41, 0.0 }
 0x1b3   : > { %v1302_v33 = vsel %vm1300_vm11, %v1269_v48, %v1025_v50  ;;  %v496_v48 = vadd.f32 %v2760_v54, %v495_v0  ;;  %v559_v0 = vpop.f32.mrf.mxu1 }
 0x1b4   : > { %v1335_v28 = vsel %vm1333_vm12, %v1302_v33, %v3014_v47  ;;  %920 = vrot.lane.b32.xlu1 %v834_v12, %s2535_s23  ;;  %1032 = vrot.lane.b32.xlu0 %v834_v12, %s2541_s20  ;;  %v3147_v12 = vsel %vm2788_vm6, 0, %v716_v15  ;;  %v676_v33 = vshrl.u32 %v3081_v57, 16 }
 0x1b5   : > { %v1368_v37 = vsel %vm1366_vm13, %v1335_v28, %v2960_v13  ;;  %v842_v13 = vsel %vm2745_vm3, %v802_v6, 0  ;;  %v584_v45 = vmax.f32 %v496_v48, 0.0  ;;  %v557_v6 = vadd.f32 %v2760_v54, %v556_v1 }
 0x1b6   : > { %v3138_v50 = vpop.permute.xlu1 %1071  ;;  %v3140_v17 = vpop.permute.xlu0 %1135  ;;  %v1401_v47 = vsel %vm1399_vm14, %v1368_v37, %v3023_v55  ;;  %v560_v28 = vadd.f32 %v2760_v54, %v559_v0  ;;  %v678_v48 = vrot.slane %v676_v33, 7 }
 0x1b7   : > { %3807 = vst [vmem:[#allocation15_spill] sm:$0xff] %v3138_v50  ;;  %3808 = vst [vmem:[#allocation16_spill] sm:$0xff] %v3140_v17  ;;  %2272 = vmatprep.mubr.msk.bf16.mxu1 %vm1459_vm15, %v1401_v47  ;;  %v609_v15 = vpack.c.bf16 %v584_v45, %v583_v4  ;;  %v679_v47 = vshll.u32 %v3081_v57, 16  ;;  %v599_v49 = vmax.f32 %v557_v6, 0.0 }
 0x1b8   : > { %1079 = vrot.lane.b32.xlu1 %v3147_v12, %s2538_s8  ;;  %1143 = vrot.lane.b32.xlu0 %v842_v13, %s2540_s18  ;;  %v600_v27 = vmax.f32 %v560_v28, 0.0 }
 0x1b9   : > { %v681_v1 = vor.u32 %v679_v47, %v678_v48  ;;  %v791_v45 = vrot.slane %v679_v47, 1  ;;  %v669_v20 = vshrl.u32 %v609_v15, 16  ;;  %v672_v28 = vshll.u32 %v609_v15, 16 }
 0x1ba   : > { %v3154_v40 = vpop.permute.xlu1 %928  ;;  %v3156_v55 = vpop.permute.xlu0 %974  ;;  %v3177_v0 = vpack.c.bf16 %v600_v27, %v599_v49  ;;  %v565_v47 = vadd.f32 %v3118_v34, %v2760_v54 }
 0x1bb   : > { %3809 = vst [vmem:[#allocation17_spill] sm:$0xff] %v3156_v55  ;;  %v792_v6 = vor.u32 %v791_v45, %v676_v33  ;;  %v671_v27 = vrot.slane %v669_v20, 7 }
 0x1bc   : > { %936 = vrot.lane.b32.xlu1 %v842_v13, %s2535_s23  ;;  %982 = vrot.lane.b32.xlu0 %v3147_v12, %s2539_s16  ;;  %v601_v50 = vmax.f32 %v565_v47, 0.0 }
 0x1bd   : > { %v837_v33 = vsel %vm2745_vm3, %v792_v6, 0 }
 0x1be   : > { %v3164_v37 = vpop.permute.xlu1 %1091  ;;  %v3166_v32 = vpop.permute.xlu0 %1040  ;;  %v3213_v16 = vpack.c.bf16 %v602_v10, %v601_v50 }
 0x1bf   : > { %3810 = vst [vmem:[#allocation18_spill] sm:$0xff] %v3166_v32  ;;  %v674_v32 = vor.u32 %v672_v28, %v671_v27 }
 0x1c0   : > { %1099 = vrot.lane.b32.xlu1 %v609_v15, %s2536_s21  ;;  %1048 = vrot.lane.b32.xlu0 %v842_v13, %s2541_s20  ;;  %v3185_v13 = vsel %vm2788_vm6, 0, %v681_v1 }
 0x1c1   : > { %v3217_v6 = vsel %vm2788_vm6, 0, %v674_v32  ;;  %v735_v32 = vshll.u32 %v3213_v16, 16 }
 0x1c2   : > { %v3171_v25 = vpop.permute.xlu1 %868  ;;  %v3173_v4 = vpop.permute.xlu0 %995  ;;  %3811 = vst [vmem:[#allocation19_spill] sm:$0xff] %v3217_v6 }
 0x1c3   : > { %v807_v55 = vrot.slane %v735_v32, 1 }
 0x1c4   : > { %876 = vrot.lane.b32.xlu1 %v609_v15, %s2534_s12  ;;  %1003 = vrot.lane.b32.xlu0 %v609_v15, %s2537_s9  ;;  %v789_v15 = vrot.slane %v672_v28, 1  ;;  %v732_v28 = vshrl.u32 %v3213_v16, 16 }
 0x1c6   : > { %v3179_v17 = vpop.permute.xlu1 %1107  ;;  %v3181_v57 = vpop.permute.xlu0 %1011  ;;  %v790_v63 = vor.u32 %v789_v15, %v669_v20 }
 0x1c8   : > { %1115 = vrot.lane.b32.xlu1 %v3177_v0, %s2536_s21  ;;  %1069 = vrot.lane.b32.xlu0 %v3185_v13, %s2538_s8  ;;  %v836_v47 = vsel %vm2745_vm3, %v790_v63, 0  ;;  %v734_v63 = vrot.slane %v732_v28, 7 }
 0x1ca   : > { %v3191_v48 = vpop.permute.xlu1 %884  ;;  %v3193_v49 = vpop.permute.xlu0 %1061  ;;  %v737_v15 = vor.u32 %v735_v32, %v734_v63  ;;  %v728_v32 = vshll.u32 %v3177_v0, 16 }
 0x1cb   : > { %v1189_v23 = vsel %vm1153_vm8, %v2976_v22, %v3191_v48  ;;  %v1186_v22 = vsel %vm1153_vm8, %v2811_v38, %v2994_v36 }
 0x1cc   : > { %972 = vrot.lane.b32.xlu1 %v3185_v13, %s2539_s16  ;;  %1133 = vrot.lane.b32.xlu0 %v837_v33, %s2540_s18  ;;  %v774_v63 = vsel %vm2788_vm6, 0, %v737_v15  ;;  %v1224_v48 = vsel %vm1202_vm9, %v1186_v22, %v3069_v39 }
 0x1ce   : > { %v3203_v1 = vpop.permute.xlu1 %964  ;;  %v3205_v45 = vpop.permute.xlu0 %1125 }
 0x1d0   : > { %1038 = vrot.lane.b32.xlu1 %v837_v33, %s2541_s20  ;;  %926 = vrot.lane.b32.xlu0 %v837_v33, %s2535_s23 }
 0x1d2   : > { %v3209_v54 = vpop.permute.xlu1 %1030  ;;  %v3211_v34 = vpop.permute.xlu0 %918 }
 0x1d4   : > { %1067 = vrot.lane.b32.xlu1 %v3217_v6, %s2538_s8  ;;  %1131 = vrot.lane.b32.xlu0 %v836_v47, %s2540_s18 }
 0x1d6   : > { %v3224_v20 = vpop.permute.xlu1 %980  ;;  %v3226_v41 = vpop.permute.xlu0 %1077 }
 0x1d8   : > { %924 = vrot.lane.b32.xlu1 %v836_v47, %s2535_s23  ;;  %970 = vrot.lane.b32.xlu0 %v3217_v6, %s2539_s16  ;;  %v1159_v6 = vsel %vm1153_vm8, %v2839_v62, %v2983_v30 }
 0x1da   : > { %v3232_v10 = vpop.permute.xlu1 %1046  ;;  %v3234_v50 = vpop.permute.xlu0 %1141 }
 0x1dc   : > { %890 = vrot.lane.b32.xlu1 %v2939_v2, %s2534_s12  ;;  %1036 = vrot.lane.b32.xlu0 %v836_v47, %s2541_s20  ;;  %v1206_v2 = vsel %vm1202_vm9, %v1159_v6, %v3124_v7  ;;  %v725_v7 = vshrl.u32 %v3177_v0, 16 }
 0x1dd   : > { %v1239_v62 = vsel %vm1235_vm10, %v1206_v2, %v3021_v53  ;;  %v1183_v53 = vsel %vm1153_vm8, %v2853_v8, %v3012_v46  ;;  %v805_v46 = vrot.slane %v728_v32, 1 }
 0x1de   : > { %v3240_v27 = vpop.permute.xlu1 %1001  ;;  %v3242_v33 = vpop.permute.xlu0 %934  ;;  %v1271_v6 = vsel %vm361_vm0, %v1239_v62, %v2962_v14 }
 0x1df   : > { %3812 = vst [vmem:[#allocation20_spill] sm:$0xff] %v3240_v27  ;;  %v1304_v14 = vsel %vm1300_vm11, %v1271_v6, %v3030_v60  ;;  %v1162_v60 = vsel %vm1153_vm8, %v2794_v24, %v2972_v21  ;;  %v806_v21 = vor.u32 %v805_v46, %v725_v7 }
 0x1e0   : > { %892 = vrot.lane.b32.xlu1 %v3177_v0, %s2534_s12  ;;  %1145 = vrot.lane.b32.xlu0 %v3074_v44, %s2540_s18  ;;  %s3725_s12 = scalar_lea.hbm %s3782_s7, %s2178_s19 }
 0x1e2   : > { %v3253_v47 = vpop.permute.xlu1 %874  ;;  %v3255_v43 = vpop.permute.xlu0 %1097 }
 0x1e3   : > { %3813 = vst [vmem:[#allocation21_spill] sm:$0xff] %v3253_v47  ;;  %v808_v47 = vor.u32 %v807_v55, %v732_v28  ;;  %v727_v28 = vrot.slane %v725_v7, 7 }
 0x1e4   : > { %988 = vrot.lane.b32.xlu1 %v774_v63, %s2539_s16  ;;  %938 = vrot.lane.b32.xlu0 %v3074_v44, %s2535_s23  ;;  %v1222_v44 = vsel %vm1202_vm9, %v1183_v53, %v3154_v40 }
 0x1e5   : > { %v845_v8 = vsel %vm2745_vm3, %v808_v47, 0  ;;  %v1255_v62 = vsel %vm1235_vm10, %v1222_v44, %v3045_v5  ;;  %v1208_v47 = vsel %vm1202_vm9, %v1162_v60, %v3032_v61  ;;  %v1165_v5 = vsel %vm1153_vm8, %v2952_v9, %v3171_v25 }
 0x1e6   : > { %v3264_v30 = vpop.permute.xlu1 %1017  ;;  %v3266_v27 = vpop.permute.xlu0 %1113  ;;  %v1287_v24 = vsel %vm361_vm0, %v1255_v62, %v2981_v29  ;;  %v3814_v62 = vmov 0  }
 0x1e7   : > { %v1320_v25 = vsel %vm1300_vm11, %v1287_v24, %v3055_v19 }
 0x1e8   : > { %1021 = vrot.lane.b32.xlu1 %v3213_v16, %s2537_s9  ;;  %1019 = vrot.lane.b32.xlu0 %v3177_v0, %s2537_s9 }
 0x1ea   : > { %v1060_v15 = vpop.permute.xlu1 %1059  ;;  %v1124_v55 = vpop.permute.xlu0 %1123 }
 0x1eb   : > { %v1337_v2 = vsel %vm1333_vm12, %v1304_v14, %v1060_v15 }
 0x1ec   : > { %v1370_v0 = vsel %vm1366_vm13, %v1337_v2, %v3164_v37  ;;  %1054 = vrot.lane.b32.xlu1 %v845_v8, %s2541_s20  ;;  %1085 = vrot.lane.b32.xlu0 %v774_v63, %s2538_s8  ;;  %v730_v37 = vor.u32 %v728_v32, %v727_v28 }
 0x1ed   : > { %v1403_v40 = vsel %vm1399_vm14, %v1370_v0, %v1124_v55 }
 0x1ee   : > { %v917_v6 = vpop.permute.xlu1 %916  ;;  %v963_v53 = vpop.permute.xlu0 %962  ;;  %2273 = vmatmul.mubr.msk.bf16.vlgmr.msra.gmra.mxu1 %vm1459_vm15, %v1403_v40 }
 0x1ef   : > { %v1210_v63 = vsel %vm1202_vm9, %v1165_v5, %v917_v6  ;;  %v1241_v44 = vsel %vm1235_vm10, %v1208_v47, %v963_v53 }
 0x1f0   : > { %v1243_v61 = vsel %vm1235_vm10, %v1210_v63, %v3203_v1  ;;  %1087 = vrot.lane.b32.xlu1 %v3089_v56, %s2538_s8  ;;  %1117 = vrot.lane.b32.xlu0 %v3213_v16, %s2536_s21  ;;  %v1273_v29 = vsel %vm361_vm0, %v1241_v44, %v3173_v4  ;;  %v3324_v16 = vsel %vm2788_vm6, 0, %v730_v37 }
 0x1f1   : > { %v1275_v9 = vsel %vm361_vm0, %v1243_v61, %v3067_v35  ;;  %v844_v35 = vsel %vm2745_vm3, %v806_v21, 0 }
 0x1f2   : > { %v1076_v32 = vpop.permute.xlu1 %1075  ;;  %v1029_v7 = vpop.permute.xlu0 %1028  ;;  %v1308_v1 = vsel %vm1300_vm11, %v1275_v9, %v3209_v54 }
 0x1f3   : > { %v1353_v15 = vsel %vm1333_vm12, %v1320_v25, %v1076_v32  ;;  %v1306_v56 = vsel %vm1300_vm11, %v1273_v29, %v1029_v7 }
 0x1f4   : > { %v1339_v19 = vsel %vm1333_vm12, %v1306_v56, %v3193_v49  ;;  %1083 = vrot.lane.b32.xlu1 %v3324_v16, %s2538_s8  ;;  %1147 = vrot.lane.b32.xlu0 %v844_v35, %s2540_s18  ;;  %v1386_v4 = vsel %vm1366_vm13, %v1353_v15, %v3179_v17 }
 0x1f5   : > { %v1372_v54 = vsel %vm1366_vm13, %v1339_v19, %v3085_v59 }
 0x1f6   : > { %v933_v51 = vpop.permute.xlu1 %932  ;;  %v1140_v14 = vpop.permute.xlu0 %1139  ;;  %v1405_v49 = vsel %vm1399_vm14, %v1372_v54, %v3205_v45 }
 0x1f7   : > { %v1226_v55 = vsel %vm1202_vm9, %v1189_v23, %v933_v51  ;;  %v3344_v28 = vsel %vm1399_vm14, %v1386_v4, %v1140_v14  ;;  %2276 = vmatprep.mubr.msk.bf16.mxu1 %vm1459_vm15, %v1405_v49  ;;  %v1192_v49 = vsel %vm1153_vm8, %v2907_v42, %v3111_v18 }
 0x1f8   : > { %v1259_v17 = vsel %vm1235_vm10, %v1226_v55, %v3224_v20  ;;  %940 = vrot.lane.b32.xlu1 %v844_v35, %s2535_s23  ;;  %986 = vrot.lane.b32.xlu0 %v3324_v16, %s2539_s16  ;;  %v1228_v55 = vsel %vm1202_vm9, %v1192_v49, %v3242_v33 }
 0x1f9   : > { %v1291_v59 = vsel %vm361_vm0, %v1259_v17, %v3098_v3 }
 0x1fa   : > { %v1096_v45 = vpop.permute.xlu1 %1095  ;;  %v979_v2 = vpop.permute.xlu0 %978  ;;  %v1324_v20 = vsel %vm1300_vm11, %v1291_v59, %v3232_v10 }
 0x1fb   : > { %v1257_v46 = vsel %vm1235_vm10, %v1224_v48, %v979_v2 }
 0x1fc   : > { %1119 = vrot.lane.b32.xlu1 %v3814_v62, %s2536_s21  ;;  %1052 = vrot.lane.b32.xlu0 %v844_v35, %s2541_s20  ;;  %v1289_v38 = vsel %vm361_vm0, %v1257_v46, %v3181_v57 }
 0x1fe   : > { %v3367_v36 = vpop.permute.xlu1 %872  ;;  %v1045_v3 = vpop.permute.xlu0 %1044 }
 0x1ff   : > { %v1322_v39 = vsel %vm1300_vm11, %v1289_v38, %v1045_v3  ;;  %v1705_v3 = vld [vmem:[%s3780_s5] sm:$0x3] }
 0x200   : > { %v1355_v0 = vsel %vm1333_vm12, %v1322_v39, %v3226_v41  ;;  %1151 = vrot.lane.b32.xlu1 %v2751_v52, %s2540_s18  ;;  %1149 = vrot.lane.b32.xlu0 %v845_v8, %s2540_s18  ;;  %s3829_s18 = sshll.u32 %s2681_s17, 8 }
 0x201   : > { %v1388_v10 = vsel %vm1366_vm13, %v1355_v0, %v3100_v11  ;;  %2341 = vmatprep.subr.msk.bf16.mxu0 %vm1492_vm7, %v1705_v3  ;;  %s3599_s20 = scalar_lea.vmem [#allocation5], %s3829_s18 }
 0x202   : > { %v1112_v60 = vpop.permute.xlu1 %1111  ;;  %v1000_v40 = vpop.permute.xlu0 %999  ;;  %v3379_v57 = vsel %vm1399_vm14, %v1388_v10, %v3234_v50  ;;  %v1168_v50 = vsel %vm1153_vm8, %v2882_v26, %v3083_v58  ;;  %v1171_v10 = vsel %vm1153_vm8, %v3116_v31, %v3367_v36  ;;  %s2035_s22 = sshll.u32 %s3599_s20, 4  ;;  %s3729_s22 = int_to_ptr.vmem [resolvable:$true] %s2035_s22 }
 0x203   : > { %v1212_v9 = vsel %vm1202_vm9, %v1168_v50, %v3211_v34  ;;  %v3816_v50 = vld [vmem:[#allocation17_spill] sm:$0xff]  ;;  %s2464_s21 = scalar_lea.vmem %s3729_s22, 4096 }
 0x204   : > { %p2465_p11 = scmp.ne.s32.totalorder %s3729_s22, %s2464_s21 }
 0x206   : > { %v889_v47 = vpop.permute.xlu1 %888  ;;  %v1016_v5 = vpop.permute.xlu0 %1015  ;;  %p2466_p13 = pnand %p2465_p11, %p3830_p12 }
 0x208   : > { %p2467_p4 = pneg %p2466_p13 }
 0x20a   : > { %v969_v6 = vpop.permute.xlu1 %968  ;;  %v1066_v53 = vpop.permute.xlu0 %1065 }
 0x20e   : > { %v3381_v37 = vpop.permute.xlu1 %1034  ;;  %v1130_v41 = vpop.permute.xlu0 %1129 }
 0x212   : > { %v985_v63 = vpop.permute.xlu1 %984  ;;  %v3383_v52 = vpop.permute.xlu0 %922 }
 0x216   : > { %v1051_v8 = vpop.permute.xlu1 %1050  ;;  %v1082_v44 = vpop.permute.xlu0 %1081 }
 0x21a   : > { %v3385_v24 = vpop.permute.xlu1 %1005  ;;  %v3387_v11 = vpop.permute.xlu0 %1101 }
 0x21e   : > { %v879_v21 = vpop.permute.xlu1 %878  ;;  %v1128_v61 = vpop.permute.xlu0 %1127 }
 0x222   : > { %v1064_v25 = vpop.permute.xlu1 %1063  ;;  %v967_v32 = vpop.permute.xlu0 %966 }
 0x223   : > { %v1341_v29 = vsel %vm1333_vm12, %v1308_v1, %v1064_v25  ;;  %v1245_v7 = vsel %vm1235_vm10, %v1212_v9, %v967_v32  ;;  %v3817_v32 = vld [vmem:[#allocation10_spill] sm:$0xff] }
 0x224   : > { %v1374_v15 = vsel %vm1366_vm13, %v1341_v29, %v1096_v45  ;;  %v1277_v19 = vsel %vm361_vm0, %v1245_v7, %v1000_v40  ;;  %v3818_v29 = vld [vmem:[#allocation21_spill] sm:$0xff]  ;;  %v3819_v7 = vld [vmem:[#allocation11_spill] sm:$0xff] }
 0x225   : > { %v1407_v56 = vsel %vm1399_vm14, %v1374_v15, %v1128_v61  ;;  %v1174_v15 = vsel %vm1153_vm8, %v3819_v7, %v3818_v29 }
 0x226   : > { %v921_v35 = vpop.permute.xlu1 %920  ;;  %v1033_v4 = vpop.permute.xlu0 %1032  ;;  %2277 = vmatmul.mubr.msk.bf16.gmra.mxu1 %vm1459_vm15, %v1407_v56 }
 0x227   : > { %v1310_v26 = vsel %vm1300_vm11, %v1277_v19, %v1033_v4  ;;  %v3820_v19 = vld [vmem:[#allocation19_spill] sm:$0xff] }
 0x228   : > { %v1343_v58 = vsel %vm1333_vm12, %v1310_v26, %v1066_v53  ;;  %v1180_v53 = vsel %vm1153_vm8, %v3185_v13, %v879_v21 }
 0x229   : > { %v1376_v34 = vsel %vm1366_vm13, %v1343_v58, %v3255_v43  ;;  %v1195_v43 = vsel %vm1153_vm8, %v3147_v12, %v889_v47  ;;  %v3821_v58 = vld [vmem:[#allocation18_spill] sm:$0xff] }
 0x22a   : > { %v1080_v1 = vpop.permute.xlu1 %1079  ;;  %v3404_v54 = vpop.permute.xlu0 %1143  ;;  %v1409_v23 = vsel %vm1399_vm14, %v1376_v34, %v1130_v41 }
 0x22b   : > { %v1357_v51 = vsel %vm1333_vm12, %v1324_v20, %v1080_v1  ;;  %2280 = vmatprep.mubr.msk.bf16.mxu1 %vm1459_vm15, %v1409_v23 }
 0x22c   : > { %v3410_v14 = vsel %vm1366_vm13, %v1357_v51, %v1112_v60  ;;  %v1214_v60 = vsel %vm1202_vm9, %v1171_v10, %v921_v35  ;;  %v1216_v35 = vsel %vm1202_vm9, %v1174_v15, %v3383_v52  ;;  %v3826_v10 = vld [vmem:[#allocation16_spill] sm:$0xff] }
 0x22e   : > { %v937_v17 = vpop.permute.xlu1 %936  ;;  %v983_v22 = vpop.permute.xlu0 %982 }
 0x22f   : > { %v1230_v59 = vsel %vm1202_vm9, %v1195_v43, %v937_v17  ;;  %v1261_v48 = vsel %vm1235_vm10, %v1228_v55, %v983_v22  ;;  %v3822_v22 = vld [vmem:[#allocation12_spill] sm:$0xff] }
 0x230   : > { %v1263_v45 = vsel %vm1235_vm10, %v1230_v59, %v985_v63  ;;  %v1293_v2 = vsel %vm361_vm0, %v1261_v48, %v1016_v5  ;;  %v1247_v5 = vsel %vm1235_vm10, %v1214_v60, %v969_v6 }
 0x231   : > { %v1295_v20 = vsel %vm361_vm0, %v1263_v45, %v3264_v30  ;;  %v1762_v30 = vsel %vm1492_vm7, %v1705_v3, 0  ;;  %v3823_v45 = vld [vmem:[#allocation15_spill] sm:$0xff] }
 0x232   : > { %v1100_v42 = vpop.permute.xlu1 %1099  ;;  %v1049_v18 = vpop.permute.xlu0 %1048  ;;  %v3426_v33 = vsel %vm1300_vm11, %v1295_v20, %v1051_v8  ;;  %2305 = vmatpush3.bf16.msra.mxu0 %v1762_v30 }
 0x233   : > { %v1326_v12 = vsel %vm1300_vm11, %v1293_v2, %v1049_v18 }
 0x234   : > { %v3430_v46 = vsel %vm1333_vm12, %v1326_v12, %v1082_v44  ;;  %v3815_v44 = vld [vmem:[#allocation20_spill] sm:$0xff] }
 0x235   : > { %v1279_v61 = vsel %vm361_vm0, %v1247_v5, %v3815_v44  ;;  %v3825_v12 = vld [vmem:[#allocation8_spill] sm:$0xff] }
 0x236   : > { %v877_v62 = vpop.permute.xlu1 %876  ;;  %v1004_v38 = vpop.permute.xlu0 %1003  ;;  %v1312_v31 = vsel %vm1300_vm11, %v1279_v61, %v3381_v37  ;;  %v1423_v61 = vsel %vm1399_vm14, %v3410_v14, %v3404_v54 }
 0x237   : > { %v1177_v37 = vsel %vm1153_vm8, %v3820_v19, %v877_v62 }
 0x23a   : > { %v3435_v39 = vpop.permute.xlu1 %1115  ;;  %v1070_v0 = vpop.permute.xlu0 %1069 }
 0x23e   : > { %v973_v40 = vpop.permute.xlu1 %972  ;;  %v1134_v47 = vpop.permute.xlu0 %1133 }
 0x242   : > { %v1039_v41 = vpop.permute.xlu1 %1038  ;;  %v927_v63 = vpop.permute.xlu0 %926 }
 0x243   : > { %v1220_v8 = vsel %vm1202_vm9, %v1180_v53, %v927_v63 }
 0x244   : > { %v1253_v9 = vsel %vm1235_vm10, %v1220_v8, %v3816_v50  ;;  %v1392_v50 = vsel %vm1366_vm13, %v3430_v46, %v3266_v27 }
 0x245   : > { %v1285_v13 = vsel %vm361_vm0, %v1253_v9, %v3817_v32 }
 0x246   : > { %v1068_v36 = vpop.permute.xlu1 %1067  ;;  %v1132_v25 = vpop.permute.xlu0 %1131  ;;  %v1318_v34 = vsel %vm1300_vm11, %v1285_v13, %v3821_v58 }
 0x247   : > { %v1345_v6 = vsel %vm1333_vm12, %v1312_v31, %v1068_v36  ;;  %v1351_v59 = vsel %vm1333_vm12, %v1318_v34, %v3822_v22 }
 0x248   : > { %v1378_v21 = vsel %vm1366_vm13, %v1345_v6, %v1100_v42  ;;  %v3824_v42 = vld [vmem:[#allocation9_spill] sm:$0xff]  ;;  %v1384_v62 = vsel %vm1366_vm13, %v1351_v59, %v3825_v12 }
 0x249   : > { %v1411_v56 = vsel %vm1399_vm14, %v1378_v21, %v1132_v25  ;;  %v3828_v25 = vld [vmem:[#allocation14_spill] sm:$0xff] }
 0x24a   : > { %v925_v4 = vpop.permute.xlu1 %924  ;;  %v971_v26 = vpop.permute.xlu0 %970  ;;  %2281 = vmatmul.mubr.msk.bf16.gmra.mxu1 %vm1459_vm15, %v1411_v56 }
 0x24b   : > { %v1218_v1 = vsel %vm1202_vm9, %v1177_v37, %v925_v4  ;;  %v1249_v23 = vsel %vm1235_vm10, %v1216_v35, %v971_v26 }
 0x24c   : > { %v1251_v51 = vsel %vm1235_vm10, %v1218_v1, %v973_v40  ;;  %v1281_v43 = vsel %vm361_vm0, %v1249_v23, %v1004_v38 }
 0x24d   : > { %v1283_v49 = vsel %vm361_vm0, %v1251_v51, %v3385_v24 }
 0x24e   : > { %v1316_v52 = vsel %vm1300_vm11, %v1283_v49, %v1039_v41  ;;  %v891_v55 = vpop.permute.xlu1 %890  ;;  %v1037_v17 = vpop.permute.xlu0 %1036  ;;  %v3537_v49 = vld [vmem:[%s3779_s4] ss:$0 sm:$0xff] }
 0x24f   : > { %v1314_v48 = vsel %vm1300_vm11, %v1281_v43, %v1037_v17  ;;  %v1349_v2 = vsel %vm1333_vm12, %v1316_v52, %v3823_v45  ;;  %v1198_v54 = vsel %vm1153_vm8, %v3828_v25, %v891_v55 }
 0x250   : > { %v1347_v20 = vsel %vm1333_vm12, %v1314_v48, %v1070_v0  ;;  %v1382_v18 = vsel %vm1366_vm13, %v1349_v2, %v3824_v42  ;;  %v3827_v0 = vld [vmem:[#allocation13_spill] sm:$0xff] }
 0x251   : > { %v1380_v24 = vsel %vm1366_vm13, %v1347_v20, %v3387_v11  ;;  %v1415_v60 = vsel %vm1399_vm14, %v1382_v18, %v3826_v10  ;;  %v1417_v40 = vsel %vm1399_vm14, %v1384_v62, %v3827_v0 }
 0x252   : > { %v893_v38 = vpop.permute.xlu1 %892  ;;  %v1146_v3 = vpop.permute.xlu0 %1145  ;;  %v1413_v30 = vsel %vm1399_vm14, %v1380_v24, %v1134_v47 }
 0x253   : > { %2284 = vmatprep.mubr.msk.bf16.mxu1 %vm1459_vm15, %v1413_v30  ;;  %v1425_v9 = vsel %vm1399_vm14, %v1392_v50, %v1146_v3  ;;  %v1201_v27 = vsel %vm1153_vm8, %v3324_v16, %v893_v38 }
 0x254   : > { %2285 = vmatmul.mubr.msk.bf16.gmra.mxu1 %vm1459_vm15, %v1415_v60 }
 0x255   : > { %2288 = vmatprep.mubr.msk.bf16.mxu1 %vm1459_vm15, %v1417_v40 }
 0x256   : > { %v989_v11 = vpop.permute.xlu1 %988  ;;  %v939_v5 = vpop.permute.xlu0 %938 }
 0x257   : > { %v1232_v14 = vsel %vm1202_vm9, %v1198_v54, %v939_v5 }
 0x25a   : > { %v1022_v53 = vpop.permute.xlu1 %1021  ;;  %v1020_v41 = vpop.permute.xlu0 %1019 }
 0x25c   : > { %2289 = vmatmul.mubr.msk.bf16.gmra.mxu1 %vm1459_vm15, %v3344_v28 }
 0x25d   : > { %2292 = vmatprep.mubr.msk.bf16.mxu1 %vm1459_vm15, %v3379_v57 }
 0x25e   : > { %v1055_v47 = vpop.permute.xlu1 %1054  ;;  %v1086_v63 = vpop.permute.xlu0 %1085 }
 0x262   : > { %v1088_v8 = vpop.permute.xlu1 %1087  ;;  %v1118_v44 = vpop.permute.xlu0 %1117 }
 0x264   : > { %2293 = vmatmul.mubr.msk.bf16.gmra.mxu1 %vm1459_vm15, %v1423_v61 }
 0x265   : > { %2296 = vmatprep.mubr.msk.bf16.mxu1 %vm1459_vm15, %v1425_v9 }
 0x266   : > { %v1084_v28 = vpop.permute.xlu1 %1083  ;;  %v1148_v57 = vpop.permute.xlu0 %1147 }
 0x267   : > { %v1361_v31 = vsel %vm1333_vm12, %v3426_v33, %v1084_v28 }
 0x268   : > { %v1394_v36 = vsel %vm1366_vm13, %v1361_v31, %v3435_v39 }
 0x269   : > { %v1427_v32 = vsel %vm1399_vm14, %v1394_v36, %v1148_v57 }
 0x26a   : > { %v941_v46 = vpop.permute.xlu1 %940  ;;  %v987_v6 = vpop.permute.xlu0 %986 }
 0x26b   : > { %v1234_v13 = vsel %vm1202_vm9, %v1201_v27, %v941_v46  ;;  %v1265_v21 = vsel %vm1235_vm10, %v1232_v14, %v987_v6 }
 0x26c   : > { %v1267_v33 = vsel %vm1235_vm10, %v1234_v13, %v989_v11  ;;  %2297 = vmatmul.mubr.msk.bf16.gmra.mxu1 %vm1459_vm15, %v1427_v32  ;;  %v1297_v16 = vsel %vm361_vm0, %v1265_v21, %v1020_v41 }
 0x26d   : > { %v1299_v39 = vsel %vm361_vm0, %v1267_v33, %v1022_v53 }
 0x26e   : > { %v1332_v29 = vsel %vm1300_vm11, %v1299_v39, %v1055_v47  ;;  %v1120_v7 = vpop.permute.xlu1 %1119  ;;  %v1053_v15 = vpop.permute.xlu0 %1052 }
 0x26f   : > { %v1365_v56 = vsel %vm1333_vm12, %v1332_v29, %v1088_v8  ;;  %v1330_v35 = vsel %vm1300_vm11, %v1297_v16, %v1053_v15 }
 0x270   : > { %v1363_v19 = vsel %vm1333_vm12, %v1330_v35, %v1086_v63  ;;  %v1398_v4 = vsel %vm1366_vm13, %v1365_v56, %v1120_v7 }
 0x271   : > { %v1396_v37 = vsel %vm1366_vm13, %v1363_v19, %v1118_v44 }
 0x272   : > { %v1152_v26 = vpop.permute.xlu1 %1151  ;;  %v1150_v58 = vpop.permute.xlu0 %1149 }
 0x273   : > { %v1431_v34 = vsel %vm1399_vm14, %v1398_v4, %v1152_v26  ;;  %v1429_v1 = vsel %vm1399_vm14, %v1396_v37, %v1150_v58 }
 0x274   : > { %2300 = vmatprep.mubr.msk.bf16.mxu1 %vm1459_vm15, %v1429_v1 }
 0x275   : > { %2301 = vmatmul.mubr.msk.bf16.gmra.mxu1 %vm1459_vm15, %v1431_v34 }
 0x2ae   : > { %v2274_v23 = vpop.f32.mrf.mxu1 }
 0x2af   : > { %v1539_v17 = vadd.f32 %v2274_v23, %v3537_v49 }
 0x2b0   : > { %v1530_v51 = vpop.f32.mrf.mxu1 }
 0x2b1   : > { %v1531_v55 = vadd.f32 %v3537_v49, %v1530_v51  ;;  %v1659_v20 = vmax.f32 %v1539_v17, 0.0 }
 0x2b2   : > { %v2275_v52 = vpop.f32.mrf.mxu1 }
 0x2b3   : > { %v1542_v43 = vadd.f32 %v2275_v52, %v3537_v49  ;;  %v1657_v45 = vmax.f32 %v1531_v55, 0.0 }
 0x2b4   : > { %v1533_v22 = vpop.f32.mrf.mxu1 }
 0x2b5   : > { %v1534_v59 = vadd.f32 %v3537_v49, %v1533_v22  ;;  %v1660_v48 = vmax.f32 %v1542_v43, 0.0 }
 0x2b7   : > { %v1658_v2 = vmax.f32 %v1534_v59, 0.0  ;;  %v1690_v18 = vpack.c.bf16 %v1660_v48, %v1659_v20 }
 0x2b9   : > { %v1689_v42 = vpack.c.bf16 %v1658_v2, %v1657_v45 }
 0x2bb   : > { %2306 = vmatprep.mubr.msk.bf16.mxu0 %vm1153_vm8, %v1689_v42 }
 0x2bc   : > { %2307 = vmatmul.mubr.msk.bf16.vlgmr.msra.gmra.mxu0 %vm1153_vm8, %v1690_v18 }
 0x2e6   : > { %v2278_v24 = vpop.f32.mrf.mxu1 }
 0x2e7   : > { %v1555_v30 = vadd.f32 %v2278_v24, %v3537_v49 }
 0x2e8   : > { %v1546_v12 = vpop.f32.mrf.mxu1 }
 0x2e9   : > { %v1547_v38 = vadd.f32 %v3537_v49, %v1546_v12  ;;  %v1663_v5 = vmax.f32 %v1555_v30, 0.0 }
 0x2ea   : > { %v2279_v62 = vpop.f32.mrf.mxu1 }
 0x2eb   : > { %v1558_v3 = vadd.f32 %v2279_v62, %v3537_v49  ;;  %v1661_v40 = vmax.f32 %v1547_v38, 0.0 }
 0x2ec   : > { %v1549_v10 = vpop.f32.mrf.mxu1 }
 0x2ed   : > { %v1550_v60 = vadd.f32 %v3537_v49, %v1549_v10  ;;  %v1664_v0 = vmax.f32 %v1558_v3, 0.0 }
 0x2ef   : > { %v1662_v11 = vmax.f32 %v1550_v60, 0.0  ;;  %v1692_v41 = vpack.c.bf16 %v1664_v0, %v1663_v5 }
 0x2f1   : > { %v1691_v53 = vpack.c.bf16 %v1662_v11, %v1661_v40 }
 0x2f3   : > { %2310 = vmatprep.mubr.msk.bf16.mxu0 %vm1153_vm8, %v1691_v53 }
 0x2f4   : > { %2311 = vmatmul.mubr.msk.bf16.gmra.mxu0 %vm1153_vm8, %v1692_v41 }
 0x30a   : > { %v2282_v47 = vpop.f32.mrf.mxu1 }
 0x30b   : > { %v1571_v50 = vadd.f32 %v2282_v47, %v3537_v49 }
 0x30c   : > { %v1562_v63 = vpop.f32.mrf.mxu1 }
 0x30d   : > { %v1563_v44 = vadd.f32 %v3537_v49, %v1562_v63  ;;  %v1667_v25 = vmax.f32 %v1571_v50, 0.0 }
 0x30e   : > { %v2283_v8 = vpop.f32.mrf.mxu1 }
 0x30f   : > { %v1574_v61 = vadd.f32 %v2283_v8, %v3537_v49  ;;  %v1665_v31 = vmax.f32 %v1563_v44, 0.0 }
 0x310   : > { %v1565_v9 = vpop.f32.mrf.mxu1 }
 0x311   : > { %v1566_v28 = vadd.f32 %v3537_v49, %v1565_v9  ;;  %v1668_v57 = vmax.f32 %v1574_v61, 0.0 }
 0x313   : > { %v1666_v36 = vmax.f32 %v1566_v28, 0.0  ;;  %v1694_v14 = vpack.c.bf16 %v1668_v57, %v1667_v25 }
 0x314   : > { %v2286_v54 = vpop.f32.mrf.mxu1 }
 0x315   : > { %v1693_v27 = vpack.c.bf16 %v1666_v36, %v1665_v31  ;;  %v1587_v21 = vadd.f32 %v2286_v54, %v3537_v49 }
 0x316   : > { %v1578_v46 = vpop.f32.mrf.mxu1 }
 0x317   : > { %2314 = vmatprep.mubr.msk.bf16.mxu0 %vm1153_vm8, %v1693_v27  ;;  %v1579_v32 = vadd.f32 %v3537_v49, %v1578_v46  ;;  %v1671_v56 = vmax.f32 %v1587_v21, 0.0 }
 0x318   : > { %v2287_v6 = vpop.f32.mrf.mxu1  ;;  %2315 = vmatmul.mubr.msk.bf16.gmra.mxu0 %vm1153_vm8, %v1694_v14 }
 0x319   : > { %v1590_v13 = vadd.f32 %v2287_v6, %v3537_v49  ;;  %v1669_v16 = vmax.f32 %v1579_v32, 0.0 }
 0x31a   : > { %v1581_v33 = vpop.f32.mrf.mxu1 }
 0x31b   : > { %v1582_v39 = vadd.f32 %v3537_v49, %v1581_v33  ;;  %v1672_v29 = vmax.f32 %v1590_v13, 0.0 }
 0x31c   : > { %v2290_v7 = vpop.f32.mrf.mxu1 }
 0x31d   : > { %v1670_v15 = vmax.f32 %v1582_v39, 0.0  ;;  %v1696_v37 = vpack.c.bf16 %v1672_v29, %v1671_v56  ;;  %v1603_v34 = vadd.f32 %v2290_v7, %v3537_v49  ;;  %v3590_v39 = vld [vmem:[%s3781_s6] ss:$0 sm:$0xff] }
 0x31e   : > { %v1594_v35 = vpop.f32.mrf.mxu1 }
 0x31f   : > { %v1695_v19 = vpack.c.bf16 %v1670_v15, %v1669_v16  ;;  %v1595_v26 = vadd.f32 %v3537_v49, %v1594_v35  ;;  %v1675_v17 = vmax.f32 %v1603_v34, 0.0  ;;  %v2404_v16 = vld [vmem:[%s2687_s15 + $0x10] sm:$0xff] }
 0x320   : > { %v2291_v4 = vpop.f32.mrf.mxu1 }
 0x321   : > { %v1606_v58 = vadd.f32 %v2291_v4, %v3537_v49  ;;  %2318 = vmatprep.mubr.msk.bf16.mxu0 %vm1153_vm8, %v1695_v19  ;;  %v1673_v55 = vmax.f32 %v1595_v26, 0.0 }
 0x322   : > { %v1597_v1 = vpop.f32.mrf.mxu1  ;;  %2319 = vmatmul.mubr.msk.bf16.gmra.mxu0 %vm1153_vm8, %v1696_v37  ;;  %v2405_v37 = vld [vmem:[%s2687_s15] sm:$0xff] }
 0x323   : > { %v1598_v23 = vadd.f32 %v3537_v49, %v1597_v1  ;;  %v1676_v51 = vmax.f32 %v1606_v58, 0.0  ;;  %v2406_v1 = vld [vmem:[%s2687_s15 + $0x18] sm:$0xff] }
 0x324   : > { %v2294_v52 = vpop.f32.mrf.mxu1 }
 0x325   : > { %v1674_v43 = vmax.f32 %v1598_v23, 0.0  ;;  %v1698_v48 = vpack.c.bf16 %v1676_v51, %v1675_v17  ;;  %v1619_v42 = vadd.f32 %v2294_v52, %v3537_v49 }
 0x326   : > { %v1610_v22 = vpop.f32.mrf.mxu1 }
 0x327   : > { %v1697_v59 = vpack.c.bf16 %v1674_v43, %v1673_v55  ;;  %v1611_v2 = vadd.f32 %v3537_v49, %v1610_v22  ;;  %v1679_v30 = vmax.f32 %v1619_v42, 0.0  ;;  %v2407_v55 = vld [vmem:[%s2687_s15 + $0x8] sm:$0xff] }
 0x328   : > { %v2295_v45 = vpop.f32.mrf.mxu1 }
 0x329   : > { %v1622_v20 = vadd.f32 %v2295_v45, %v3537_v49  ;;  %2322 = vmatprep.mubr.msk.bf16.mxu0 %vm1153_vm8, %v1697_v59  ;;  %v1677_v38 = vmax.f32 %v1611_v2, 0.0  ;;  %v2408_v45 = vld [vmem:[%s2687_s15 + $0x30] sm:$0xff] }
 0x32a   : > { %v1613_v18 = vpop.f32.mrf.mxu1  ;;  %2323 = vmatmul.mubr.msk.bf16.gmra.mxu0 %vm1153_vm8, %v1698_v48 }
 0x32b   : > { %v1614_v24 = vadd.f32 %v3537_v49, %v1613_v18  ;;  %v1680_v12 = vmax.f32 %v1622_v20, 0.0 }
 0x32c   : > { %v2298_v62 = vpop.f32.mrf.mxu1 }
 0x32d   : > { %v1678_v3 = vmax.f32 %v1614_v24, 0.0  ;;  %v1700_v0 = vpack.c.bf16 %v1680_v12, %v1679_v30  ;;  %v1635_v53 = vadd.f32 %v2298_v62, %v3537_v49  ;;  %v2409_v24 = vld [vmem:[%s2687_s15 + $0x20] sm:$0xff]  ;;  %v2410_v30 = vld [vmem:[%s2687_s15 + $0x38] sm:$0xff] }
 0x32e   : > { %v1626_v10 = vpop.f32.mrf.mxu1 }
 0x32f   : > { %v1699_v60 = vpack.c.bf16 %v1678_v3, %v1677_v38  ;;  %v1627_v11 = vadd.f32 %v3537_v49, %v1626_v10  ;;  %v1683_v50 = vmax.f32 %v1635_v53, 0.0 }
 0x330   : > { %v2299_v40 = vpop.f32.mrf.mxu1 }
 0x331   : > { %v1638_v5 = vadd.f32 %v2299_v40, %v3537_v49  ;;  %2326 = vmatprep.mubr.msk.bf16.mxu0 %vm1153_vm8, %v1699_v60  ;;  %v1681_v8 = vmax.f32 %v1627_v11, 0.0  ;;  %v2411_v40 = vld [vmem:[%s2687_s15 + $0x28] sm:$0xff] }
 0x332   : > { %v1629_v41 = vpop.f32.mrf.mxu1  ;;  %2327 = vmatmul.mubr.msk.bf16.gmra.mxu0 %vm1153_vm8, %v1700_v0 }
 0x333   : > { %v1630_v47 = vadd.f32 %v3537_v49, %v1629_v41  ;;  %v1684_v63 = vmax.f32 %v1638_v5, 0.0 }
 0x335   : > { %v1682_v44 = vmax.f32 %v1630_v47, 0.0  ;;  %v2302_v61 = vpop.f32.mrf.mxu1  ;;  %v1702_v57 = vpack.c.bf16 %v1684_v63, %v1683_v50  ;;  %v2412_v63 = vld [vmem:[%s2687_s15 + $0x50] sm:$0xff] }
 0x336   : > { %v1651_v54 = vadd.f32 %v2302_v61, %v3537_v49 }
 0x337   : > { %v1701_v9 = vpack.c.bf16 %v1682_v44, %v1681_v8  ;;  %v1642_v28 = vpop.f32.mrf.mxu1 }
 0x338   : > { %v1643_v36 = vadd.f32 %v3537_v49, %v1642_v28  ;;  %v1687_v13 = vmax.f32 %v1651_v54, 0.0 }
 0x339   : > { %v2303_v31 = vpop.f32.mrf.mxu1  ;;  %2330 = vmatprep.mubr.msk.bf16.mxu0 %vm1153_vm8, %v1701_v9  ;;  %v2413_v9 = vld [vmem:[%s2687_s15 + $0x40] sm:$0xff] }
 0x33a   : > { %v1654_v25 = vadd.f32 %v2303_v31, %v3537_v49  ;;  %2331 = vmatmul.mubr.msk.bf16.gmra.mxu0 %vm1153_vm8, %v1702_v57  ;;  %v1685_v6 = vmax.f32 %v1643_v36, 0.0 }
 0x33b   : > { %v1645_v27 = vpop.f32.mrf.mxu1 }
 0x33c   : > { %v1646_v14 = vadd.f32 %v3537_v49, %v1645_v27  ;;  %v1688_v46 = vmax.f32 %v1654_v25, 0.0  ;;  %v2414_v25 = vld [vmem:[%s2687_s15 + $0x58] sm:$0xff] }
 0x33e   : > { %v1686_v32 = vmax.f32 %v1646_v14, 0.0  ;;  %v1704_v33 = vpack.c.bf16 %v1688_v46, %v1687_v13  ;;  %v2415_v46 = vld [vmem:[%s2687_s15 + $0x48] sm:$0xff] }
 0x340   : > { %v1703_v21 = vpack.c.bf16 %v1686_v32, %v1685_v6 }
 0x342   : > { %2334 = vmatprep.mubr.msk.bf16.mxu0 %vm1153_vm8, %v1703_v21 }
 0x343   : > { %2335 = vmatmul.mubr.msk.bf16.gmra.mxu0 %vm1153_vm8, %v1704_v33 }
 0x37c   : > { %v2308_v29 = vpop.f32.mrf.mxu0 }
 0x37d   : > { %v1807_v49 = vadd.f32 %v2308_v29, %v3590_v39  ;;  %v2416_v29 = vld [vmem:[%s2687_s15 + $0x70] sm:$0xff] }
 0x37e   : > { %v1798_v7 = vpop.f32.mrf.mxu0 }
 0x37f   : > { %v1927_v15 = vadd.f32 %v2404_v16, %v1807_v49  ;;  %v1799_v56 = vadd.f32 %v3590_v39, %v1798_v7 }
 0x380   : > { %v2309_v35 = vpop.f32.mrf.mxu0 }
 0x381   : > { %v1959_v19 = vmax.f32 %v1927_v15, 0.0  ;;  %v1925_v4 = vadd.f32 %v2405_v37, %v1799_v56  ;;  %v1810_v26 = vadd.f32 %v2309_v35, %v3590_v39  ;;  %v2417_v56 = vld [vmem:[%s2687_s15 + $0x60] sm:$0xff] }
 0x382   : > { %v1801_v58 = vpop.f32.mrf.mxu0 }
 0x383   : > { %1991 = vst.msk [vmem:[%s3599_s20 + $0x10] sm:$0xff] %vm361_vm0, %v1959_v19  ;;  %v1957_v34 = vmax.f32 %v1925_v4, 0.0  ;;  %v1928_v23 = vadd.f32 %v2406_v1, %v1810_v26  ;;  %v1802_v51 = vadd.f32 %v3590_v39, %v1801_v58  ;;  %v2418_v26 = vld [vmem:[%s2687_s15 + $0x78] sm:$0xff] }
 0x385   : > { %1989 = vst.msk [vmem:[%s3599_s20] sm:$0xff] %vm361_vm0, %v1957_v34  ;;  %v1960_v52 = vmax.f32 %v1928_v23, 0.0  ;;  %v1926_v43 = vadd.f32 %v2407_v55, %v1802_v51  ;;  %v2419_v51 = vld [vmem:[%s2687_s15 + $0x68] sm:$0xff] }
 0x387   : > { %1992 = vst.msk [vmem:[%s3599_s20 + $0x18] sm:$0xff] %vm361_vm0, %v1960_v52  ;;  %v1958_v17 = vmax.f32 %v1926_v43, 0.0 }
 0x389   : > { %1990 = vst.msk [vmem:[%s3599_s20 + $0x8] sm:$0xff] %vm361_vm0, %v1958_v17 }
 0x3b4   : > { %v2312_v22 = vpop.f32.mrf.mxu0 }
 0x3b5   : > { %v1823_v59 = vadd.f32 %v2312_v22, %v3590_v39  ;;  %v2420_v22 = vld [vmem:[%s2687_s15 + $0x90] sm:$0xff] }
 0x3b6   : > { %v1814_v48 = vpop.f32.mrf.mxu0 }
 0x3b7   : > { %v1931_v2 = vadd.f32 %v2408_v45, %v1823_v59  ;;  %v1815_v20 = vadd.f32 %v3590_v39, %v1814_v48 }
 0x3b8   : > { %v2313_v42 = vpop.f32.mrf.mxu0 }
 0x3b9   : > { %v1963_v18 = vmax.f32 %v1931_v2, 0.0  ;;  %v1929_v12 = vadd.f32 %v2409_v24, %v1815_v20  ;;  %v1826_v62 = vadd.f32 %v2313_v42, %v3590_v39  ;;  %v2421_v20 = vld [vmem:[%s2687_s15 + $0x80] sm:$0xff] }
 0x3ba   : > { %v1817_v38 = vpop.f32.mrf.mxu0 }
 0x3bb   : > { %1995 = vst.msk [vmem:[%s3599_s20 + $0x30] sm:$0xff] %vm361_vm0, %v1963_v18  ;;  %v1961_v3 = vmax.f32 %v1929_v12, 0.0  ;;  %v1932_v10 = vadd.f32 %v2410_v30, %v1826_v62  ;;  %v1818_v60 = vadd.f32 %v3590_v39, %v1817_v38  ;;  %v2422_v62 = vld [vmem:[%s2687_s15 + $0x98] sm:$0xff] }
 0x3bd   : > { %1993 = vst.msk [vmem:[%s3599_s20 + $0x20] sm:$0xff] %vm361_vm0, %v1961_v3  ;;  %v1964_v0 = vmax.f32 %v1932_v10, 0.0  ;;  %v1930_v11 = vadd.f32 %v2411_v40, %v1818_v60  ;;  %v2423_v60 = vld [vmem:[%s2687_s15 + $0x88] sm:$0xff] }
 0x3bf   : > { %1996 = vst.msk [vmem:[%s3599_s20 + $0x38] sm:$0xff] %vm361_vm0, %v1964_v0  ;;  %v1962_v5 = vmax.f32 %v1930_v11, 0.0 }
 0x3c1   : > { %1994 = vst.msk [vmem:[%s3599_s20 + $0x28] sm:$0xff] %vm361_vm0, %v1962_v5 }
 0x3d8   : > { %v2316_v53 = vpop.f32.mrf.mxu0 }
 0x3d9   : > { %v1839_v41 = vadd.f32 %v2316_v53, %v3590_v39  ;;  %v2424_v53 = vld [vmem:[%s2687_s15 + $0xb0] sm:$0xff] }
 0x3da   : > { %v1830_v47 = vpop.f32.mrf.mxu0 }
 0x3db   : > { %v1935_v8 = vadd.f32 %v2412_v63, %v1839_v41  ;;  %v1831_v44 = vadd.f32 %v3590_v39, %v1830_v47 }
 0x3dc   : > { %v2317_v61 = vpop.f32.mrf.mxu0 }
 0x3dd   : > { %v1967_v50 = vmax.f32 %v1935_v8, 0.0  ;;  %v1933_v28 = vadd.f32 %v2413_v9, %v1831_v44  ;;  %v1842_v57 = vadd.f32 %v2317_v61, %v3590_v39  ;;  %v2425_v44 = vld [vmem:[%s2687_s15 + $0xa0] sm:$0xff] }
 0x3de   : > { %v1833_v31 = vpop.f32.mrf.mxu0 }
 0x3df   : > { %1999 = vst.msk [vmem:[%s3599_s20 + $0x50] sm:$0xff] %vm361_vm0, %v1967_v50  ;;  %v1965_v36 = vmax.f32 %v1933_v28, 0.0  ;;  %v1936_v54 = vadd.f32 %v2414_v25, %v1842_v57  ;;  %v1834_v27 = vadd.f32 %v3590_v39, %v1833_v31  ;;  %v2426_v57 = vld [vmem:[%s2687_s15 + $0xb8] sm:$0xff] }
 0x3e1   : > { %1997 = vst.msk [vmem:[%s3599_s20 + $0x40] sm:$0xff] %vm361_vm0, %v1965_v36  ;;  %v1968_v14 = vmax.f32 %v1936_v54, 0.0  ;;  %v1934_v6 = vadd.f32 %v2415_v46, %v1834_v27  ;;  %v2427_v27 = vld [vmem:[%s2687_s15 + $0xa8] sm:$0xff] }
 0x3e2   : > { %v2320_v32 = vpop.f32.mrf.mxu0 }
 0x3e3   : > { %2000 = vst.msk [vmem:[%s3599_s20 + $0x58] sm:$0xff] %vm361_vm0, %v1968_v14  ;;  %v1966_v13 = vmax.f32 %v1934_v6, 0.0  ;;  %v1855_v21 = vadd.f32 %v2320_v32, %v3590_v39 }
 0x3e4   : > { %v1846_v33 = vpop.f32.mrf.mxu0 }
 0x3e5   : > { %1998 = vst.msk [vmem:[%s3599_s20 + $0x48] sm:$0xff] %vm361_vm0, %v1966_v13  ;;  %v1939_v49 = vadd.f32 %v2416_v29, %v1855_v21  ;;  %v1847_v7 = vadd.f32 %v3590_v39, %v1846_v33  ;;  %v2428_v13 = vld [vmem:[%s2687_s15 + $0xd0] sm:$0xff] }
 0x3e6   : > { %v2321_v16 = vpop.f32.mrf.mxu0 }
 0x3e7   : > { %v1971_v15 = vmax.f32 %v1939_v49, 0.0  ;;  %v1937_v35 = vadd.f32 %v2417_v56, %v1847_v7  ;;  %v1858_v19 = vadd.f32 %v2321_v16, %v3590_v39  ;;  %v2429_v7 = vld [vmem:[%s2687_s15 + $0xc0] sm:$0xff] }
 0x3e8   : > { %v1849_v37 = vpop.f32.mrf.mxu0 }
 0x3e9   : > { %2003 = vst.msk [vmem:[%s3599_s20 + $0x70] sm:$0xff] %vm361_vm0, %v1971_v15  ;;  %v1969_v4 = vmax.f32 %v1937_v35, 0.0  ;;  %v1940_v58 = vadd.f32 %v2418_v26, %v1858_v19  ;;  %v1850_v34 = vadd.f32 %v3590_v39, %v1849_v37  ;;  %v2430_v19 = vld [vmem:[%s2687_s15 + $0xd8] sm:$0xff] }
 0x3ea   : > { %v2324_v1 = vpop.f32.mrf.mxu0 }
 0x3eb   : > { %2001 = vst.msk [vmem:[%s3599_s20 + $0x60] sm:$0xff] %vm361_vm0, %v1969_v4  ;;  %v1972_v23 = vmax.f32 %v1940_v58, 0.0  ;;  %v1938_v52 = vadd.f32 %v2419_v51, %v1850_v34  ;;  %v1871_v55 = vadd.f32 %v2324_v1, %v3590_v39  ;;  %v2431_v58 = vld [vmem:[%s2687_s15 + $0xc8] sm:$0xff] }
 0x3ec   : > { %v1862_v43 = vpop.f32.mrf.mxu0 }
 0x3ed   : > { %2004 = vst.msk [vmem:[%s3599_s20 + $0x78] sm:$0xff] %vm361_vm0, %v1972_v23  ;;  %v1970_v17 = vmax.f32 %v1938_v52, 0.0  ;;  %v1943_v59 = vadd.f32 %v2420_v22, %v1871_v55  ;;  %v1863_v48 = vadd.f32 %v3590_v39, %v1862_v43  ;;  %v2432_v55 = vld [vmem:[%s2687_s15 + $0xf0] sm:$0xff] }
 0x3ee   : > { %v2325_v45 = vpop.f32.mrf.mxu0 }
 0x3ef   : > { %2002 = vst.msk [vmem:[%s3599_s20 + $0x68] sm:$0xff] %vm361_vm0, %v1970_v17  ;;  %v1975_v2 = vmax.f32 %v1943_v59, 0.0  ;;  %v1941_v42 = vadd.f32 %v2421_v20, %v1863_v48  ;;  %v1874_v18 = vadd.f32 %v2325_v45, %v3590_v39  ;;  %v2433_v48 = vld [vmem:[%s2687_s15 + $0xe0] sm:$0xff] }
 0x3f0   : > { %v1865_v24 = vpop.f32.mrf.mxu0 }
 0x3f1   : > { %2007 = vst.msk [vmem:[%s3599_s20 + $0x90] sm:$0xff] %vm361_vm0, %v1975_v2  ;;  %v1973_v12 = vmax.f32 %v1941_v42, 0.0  ;;  %v1944_v38 = vadd.f32 %v2422_v62, %v1874_v18  ;;  %v1866_v3 = vadd.f32 %v3590_v39, %v1865_v24  ;;  %v2434_v18 = vld [vmem:[%s2687_s15 + $0xf8] sm:$0xff] }
 0x3f2   : > { %v2328_v30 = vpop.f32.mrf.mxu0 }
 0x3f3   : > { %2005 = vst.msk [vmem:[%s3599_s20 + $0x80] sm:$0xff] %vm361_vm0, %v1973_v12  ;;  %v1976_v10 = vmax.f32 %v1944_v38, 0.0  ;;  %v1942_v0 = vadd.f32 %v2423_v60, %v1866_v3  ;;  %v1887_v40 = vadd.f32 %v2328_v30, %v3590_v39  ;;  %v2435_v38 = vld [vmem:[%s2687_s15 + $0xe8] sm:$0xff]  ;;  %s2542_s15 = smov [#allocation5]  }
 0x3f4   : > { %v1878_v11 = vpop.f32.mrf.mxu0  ;;  %s2468_s9 = sshll.u32 %s2542_s15, 4  ;;  %s2469_s9 = int_to_ptr.vmem [resolvable:$false] %s2468_s9 }
 0x3f5   : > { %2008 = vst.msk [vmem:[%s3599_s20 + $0x98] sm:$0xff] %vm361_vm0, %v1976_v10  ;;  %v1974_v5 = vmax.f32 %v1942_v0, 0.0  ;;  %v1947_v41 = vadd.f32 %v2424_v53, %v1887_v40  ;;  %v1879_v47 = vadd.f32 %v3590_v39, %v1878_v11  ;;  %s2470_s8 = scalar_lea.vmem %s2469_s9, 8192  ;;  %p2471_p5 = scmp.lt.s32.totalorder %s3729_s22, %s2469_s9 }
 0x3f6   : > { %v2329_v63 = vpop.f32.mrf.mxu0  ;;  %p2472_p7 = scmp.lt.s32.totalorder %s2470_s8, %s2464_s21 }
 0x3f7   : > { %2006 = vst.msk [vmem:[%s3599_s20 + $0x88] sm:$0xff] %vm361_vm0, %v1974_v5  ;;  %v1979_v8 = vmax.f32 %v1947_v41, 0.0  ;;  %v1945_v61 = vadd.f32 %v2425_v44, %v1879_v47  ;;  %v1890_v50 = vadd.f32 %v2329_v63, %v3590_v39 }
 0x3f8   : > { %v1881_v9 = vpop.f32.mrf.mxu0  ;;  %p2473_p8 = por %p2472_p7, %p2471_p5 }
 0x3f9   : > { %2011 = vst.msk [vmem:[%s3599_s20 + $0xb0] sm:$0xff] %vm361_vm0, %v1979_v8  ;;  %v1977_v28 = vmax.f32 %v1945_v61, 0.0  ;;  %v1948_v31 = vadd.f32 %v2426_v57, %v1890_v50  ;;  %v1882_v36 = vadd.f32 %v3590_v39, %v1881_v9 }
 0x3fa   : > { %v2332_v25 = vpop.f32.mrf.mxu0  ;;  %p2474_p10 = pnand %p2473_p8, %p2467_p4 }
 0x3fb   : > { %2009 = vst.msk [vmem:[%s3599_s20 + $0xa0] sm:$0xff] %vm361_vm0, %v1977_v28  ;;  %v1980_v54 = vmax.f32 %v1948_v31, 0.0  ;;  %v1946_v14 = vadd.f32 %v2427_v27, %v1882_v36  ;;  %v1903_v46 = vadd.f32 %v2332_v25, %v3590_v39 }
 0x3fc   : > { %v1894_v6 = vpop.f32.mrf.mxu0 }
 0x3fd   : > { %2012 = vst.msk [vmem:[%s3599_s20 + $0xb8] sm:$0xff] %vm361_vm0, %v1980_v54  ;;  %v1978_v32 = vmax.f32 %v1946_v14, 0.0  ;;  %v1951_v21 = vadd.f32 %v2428_v13, %v1903_v46  ;;  %v1895_v33 = vadd.f32 %v3590_v39, %v1894_v6 }
 0x3fe   : > { %v2333_v29 = vpop.f32.mrf.mxu0 }
 0x3ff   : > { %2010 = vst.msk [vmem:[%s3599_s20 + $0xa8] sm:$0xff] %vm361_vm0, %v1978_v32  ;;  %v1983_v49 = vmax.f32 %v1951_v21, 0.0  ;;  %v1949_v16 = vadd.f32 %v2429_v7, %v1895_v33  ;;  %v1906_v15 = vadd.f32 %v2333_v29, %v3590_v39 }
 0x400   : > { %v1897_v56 = vpop.f32.mrf.mxu0 }
 0x401   : > { %2015 = vst.msk [vmem:[%s3599_s20 + $0xd0] sm:$0xff] %vm361_vm0, %v1983_v49  ;;  %v1981_v35 = vmax.f32 %v1949_v16, 0.0  ;;  %v1952_v37 = vadd.f32 %v2430_v19, %v1906_v15  ;;  %v1898_v4 = vadd.f32 %v3590_v39, %v1897_v56 }
 0x403   : > { %2013 = vst.msk [vmem:[%s3599_s20 + $0xc0] sm:$0xff] %vm361_vm0, %v1981_v35  ;;  %v1984_v26 = vmax.f32 %v1952_v37, 0.0  ;;  %v1950_v34 = vadd.f32 %v2431_v58, %v1898_v4  ;;  %v2336_v1 = vpop.f32.mrf.mxu0 }
 0x404   : > { %v1919_v23 = vadd.f32 %v2336_v1, %v3590_v39 }
 0x405   : > { %2016 = vst.msk [vmem:[%s3599_s20 + $0xd8] sm:$0xff] %vm361_vm0, %v1984_v26  ;;  %v1982_v51 = vmax.f32 %v1950_v34, 0.0  ;;  %v1910_v52 = vpop.f32.mrf.mxu0 }
 0x406   : > { %v1955_v43 = vadd.f32 %v2432_v55, %v1919_v23  ;;  %v1911_v17 = vadd.f32 %v3590_v39, %v1910_v52 }
 0x407   : > { %2014 = vst.msk [vmem:[%s3599_s20 + $0xc8] sm:$0xff] %vm361_vm0, %v1982_v51  ;;  %v2337_v22 = vpop.f32.mrf.mxu0 }
 0x408   : > { %v1987_v59 = vmax.f32 %v1955_v43, 0.0  ;;  %v1953_v45 = vadd.f32 %v2433_v48, %v1911_v17  ;;  %v1922_v2 = vadd.f32 %v2337_v22, %v3590_v39 }
 0x409   : > { %v1913_v20 = vpop.f32.mrf.mxu0 }
 0x40a   : > { %2019 = vst.msk [vmem:[%s3599_s20 + $0xf0] sm:$0xff] %vm361_vm0, %v1987_v59  ;;  %v1985_v42 = vmax.f32 %v1953_v45, 0.0  ;;  %v1956_v24 = vadd.f32 %v2434_v18, %v1922_v2  ;;  %v1914_v12 = vadd.f32 %v3590_v39, %v1913_v20 }
 0x40c   : > { %2017 = vst.msk [vmem:[%s3599_s20 + $0xe0] sm:$0xff] %vm361_vm0, %v1985_v42  ;;  %v1988_v62 = vmax.f32 %v1956_v24, 0.0  ;;  %v1954_v3 = vadd.f32 %v2435_v38, %v1914_v12 }
 0x40e   : > { %2020 = vst.msk [vmem:[%s3599_s20 + $0xf8] sm:$0xff] %vm361_vm0, %v1988_v62  ;;  %v1986_v30 = vmax.f32 %v1954_v3, 0.0 }
 0x410   : > { %2018 = vst.msk [vmem:[%s3599_s20 + $0xe8] sm:$0xff] %vm361_vm0, %v1986_v30 }
 0x411   : > { %2477 = shalt.err (!%p2474_p10)
}
 0x412   : > { %s2478_s16 = scalar_lea.hbm %s3725_s12, 4096  ;;  %s2482_s19 = scalar_lea.hbm %s3782_s7, 8192 }
 0x413   : > { %p2479_p0 = scmp.ne.s32.totalorder %s3725_s12, %s2478_s16  ;;  %p2483_p1 = scmp.lt.s32.totalorder %s3725_s12, %s3782_s7 }
 0x414   : > { %p2484_p3 = scmp.lt.s32.totalorder %s2482_s19, %s2478_s16 }
 0x415   : > { %p2480_p2 = pnand %p2479_p0, %p3830_p12 }
 0x416   : > { %p2485_p6 = por %p2484_p3, %p2483_p1 }
 0x417   : > { %p2481_p9 = pneg %p2480_p2 }
 0x419   : > { %p2486_p11 = pnand %p2485_p6, %p2481_p9 }
 0x41b   : > { %2489 = shalt.err (!%p2486_p11)
}
 0x41c   : > { %s2543_s21 = smov 128  }
 0x41d   : > { %2344 = dma.vmem_to_hbm [thread:$0]  (%p3830_p12), %s3729_s22, 4096, %s3725_s12, %s2022_s28, %s2543_s21, %s2543_s21, %s2535_s23  }
 0x41e PF: > { %s2050_s15 = sand.u32 1, %s2516_s24   ;;  %p3831_p13 = scmp.ne.s32.totalorder %s3793_s14, 0 }
 0x41f   : > { %p3832_p4 = scmp.ge.s32.totalorder %s2528_s27, 2  ;;  %s2051_s9 = scalar_lea.sflag [#allocation4], %s2050_s15 }
 0x421   : > { %p2351_p5 = pnand %p3832_p4, %p3831_p13 }
 0x423   : > { %p2352_p7 = pneg %p2351_p5 }
 0x425   : > { %2511 = dma.done.wait (%p2352_p7), %s2051_s9, 4096  }
 0x426   : > { %2513 = vsyncadd (%p2352_p7), %s2051_s9, 4294963200  ;;  %p20_p8 = scmp.ge.s32.totalorder %s2609_s30, 4   ;;  %s3833_s24 = smov %s2520_s25 }
 0x427   : > { %s3834_s25 = smov %s2524_s26  ;;  %s3835_s26 = smov %s2621_s10 }
 0x428   : > { %s3836_s27 = smov %s2609_s30  ;;  %22 = sbr.rel (!%p20_p8) target bundleno = 5 (0x5), region = 93 }
 0x42d   :  { %2056 = vsyncpa [#allocation3], 1 }
 0x42e   :  { %2058 = vsyncpa [#allocation3 + $0x1], 1 }
 0x42f   :  { %2059 = vsyncpa [#allocation4], 1 }
 0x430   :  { %2061 = vsyncpa [#allocation4 + $0x1], 1 }

</bundles_post_ra>
